<compile_context>
chip_gen: v7x
topology: tpu7x:2x2x1
jax: 0.10.0
libtpu: 0.0.40
codegen_flags: <defaults>
</compile_context>

<pallas_src>
import functools
import math

import jax
import jax.numpy as jnp
from jax import lax
from jax.experimental import pallas as pl
from jax.experimental.pallas import tpu as pltpu


# ----------------------------------------------------------------------------
# Fused EGNN kernel: one grid step == `block_b` batch elements, all layers
# ----------------------------------------------------------------------------
def _egnn_kernel(
    mask_col_ref, mask_row_ref, mask_edge_ref, h0_ref, x0_ref, ea_ref,
    ein_w_ref, ein_b_ref, eout_w_ref, eout_b_ref,
    w_h3_ref, w_ea_ref, w_hc_ref, wn1a_ref, we2_ref, wn2_ref, wc2_ref,
    wc3_ref, be1_ref, be2_ref, bn1_ref, bn2_ref, bc1_ref, bc2_ref,
    h_out_ref, x_out_ref,
    *, norm_constant,
):
    f32, bf16 = jnp.float32, jnp.bfloat16
    TB, N, Cin = h0_ref.shape
    H = we2_ref.shape[-1]
    L = we2_ref.shape[0]
    Cout = eout_w_ref.shape[-1]
    E = ea_ref.shape[-1]
    R = TB * N * N                                   # edge rows per grid step

    def silu(v):
        # x*sigmoid(x) == 0.5*x*(tanh(x/2)+1): 1 EUP op instead of exp+recip.
        return 0.5 * v * (jnp.tanh(0.5 * v) + 1.0)

    def mx(a, w):
        # bf16 MXU matmul, f32 accumulation.
        return jnp.dot(a, w, preferred_element_type=f32)

    mask_col = mask_col_ref[...]                               # (TB,N,1)
    mask2d = mask_col * mask_row_ref[...]                      # (TB,N,N)
    mask_e = mask_edge_ref[...].reshape(R, 1)                  # (R,1)

    # ---- embedding_in (fused) ----
    h = (mx(h0_ref[...].reshape(TB * N, Cin).astype(bf16), ein_w_ref[...])
         + ein_b_ref[...]).reshape(TB, N, H)
    coord = x0_ref[...]                                        # (TB,N,D) f32

    # ---- edge_attr: flattened + masked ONCE (mask commutes with matmuls) ----
    ea_m = (ea_ref[...].reshape(R, E) * mask_e).astype(bf16)   # (R,E) bf16

    def layer(l, carry):
        h, coord = carry
        h = h * mask_col                                       # h *= mask
        coord = coord * mask_col                               # coord *= mask

        # ---- coord2radial without materializing (TB,N,N,D) diffs ----
        # TODO(synk): coord2radial source not provided; standard EDM
        # normalization sqrt(radial)+norm_constant assumed.
        sq = jnp.sum(coord * coord, axis=-1)                   # (TB,N)
        gram = jnp.einsum('bid,bjd->bij', coord, coord,
                          preferred_element_type=f32)          # MXU
        radial = jnp.maximum(sq[:, :, None] + sq[:, None, :] - 2.0 * gram, 0.0)
        inv_norm = 1.0 / (jnp.sqrt(radial + 1e-8) + norm_constant)  # (TB,N,N)

        h2b = h.reshape(TB * N, H).astype(bf16)                # cast once/layer

        # edge src/tgt + node-mlp "h" projections: ONE 3H-wide matmul.
        hm3 = mx(h2b, w_h3_ref[l])                             # (TB*N, 3H)
        h_src = hm3[:, 0:H].reshape(TB, N, H)
        h_tgt = hm3[:, H:2 * H].reshape(TB, N, H)
        h_node = hm3[:, 2 * H:3 * H]                           # (TB*N, H)

        # edge-attr projections for edge-mlp + coord-mlp: ONE 2H-wide matmul.
        ea_lin = mx(ea_m, w_ea_ref[l])                         # (R, 2H)
        ea_e = ea_lin[:, 0:H].reshape(TB, N, N, H)
        ea_c = ea_lin[:, H:2 * H].reshape(TB, N, N, H)

        # -------- edge model --------
        # cat([h_j, h_i, ea]) @ We1 == ea_e + h_src (bcast over i)
        #                                   + h_tgt (bcast over j)
        pre1 = ea_e + h_src[:, None, :, :] + h_tgt[:, :, None, :] + be1_ref[l]
        e1 = silu(pre1)
        ef = silu(mx(e1.reshape(R, H).astype(bf16), we2_ref[l]) + be2_ref[l])
        # attention: softmax over a size-1 dim == 1.0 -> multiply is a no-op.
        ef = ef * mask_e                                       # edge_feat *= mask2d
        agg = jnp.sum(ef.reshape(TB * N, N, H), axis=1)        # sum_j -> (TB*N,H)

        # -------- node model --------
        n1 = silu(h_node + mx(agg.astype(bf16), wn1a_ref[l]) + bn1_ref[l])
        h_new = h + (mx(n1.astype(bf16), wn2_ref[l])
                     + bn2_ref[l]).reshape(TB, N, H)           # residual
        h_new = h_new * mask_col                               # h *= mask

        # -------- coord model (updated h, loop-invariant masked ea) --------
        hc2 = mx(h_new.reshape(TB * N, H).astype(bf16), w_hc_ref[l])  # (TB*N,2H)
        c_src = hc2[:, 0:H].reshape(TB, N, H)
        c_tgt = hc2[:, H:2 * H].reshape(TB, N, H)
        c1 = silu(ea_c + c_src[:, None, :, :] + c_tgt[:, :, None, :] + bc1_ref[l])
        c2 = silu(mx(c1.reshape(R, H).astype(bf16), wc2_ref[l]) + bc2_ref[l])
        # final Linear(H, 1, bias=False): phi = sum_k c2[..., k] * wc3[0, k]
        phi = jnp.sum(c2.reshape(TB, N, N, H) * wc3_ref[l], axis=-1)  # (TB,N,N)
        # sum_j w_ij*(c_i - c_j) == c_i * sum_j w_ij  -  W @ coord (MXU)
        w2 = phi * mask2d * inv_norm                           # (TB,N,N)
        s = jnp.sum(w2, axis=2, keepdims=True)                 # (TB,N,1)
        wcoord = jnp.einsum('bij,bjd->bid', w2, coord,
                            preferred_element_type=f32)        # (TB,N,D)
        coord = (coord + coord * s - wcoord) * mask_col        # coord *= mask
        return h_new, coord

    # TODO(synk): for production-sized N, tile the j (neighbor) axis with VMEM
    # accumulators for agg / the coord sum (mandatory within v7x's 64 MiB).
    h, coord = lax.fori_loop(0, L, layer, (h, coord))

    # ---- embedding_out (fused); reference applies no mask afterwards ----
    h_out = (mx(h.reshape(TB * N, H).astype(bf16), eout_w_ref[...])
             + eout_b_ref[...])
    # TODO(synk): a lane-dense (block_b, N*Cout) output slab would avoid masked
    # partial stores; negligible at these output sizes.
    h_out_ref[...] = h_out.reshape(TB, N, Cout)
    x_out_ref[...] = coord


def _pick_block_b(B, N, H, E, vmem_budget_bytes=48 << 20, target_rows=2048):
    """Batch elements per grid step.

    Derived from an explicit VMEM estimate (48 MiB budget, safe within v7x's
    64 MiB) and capped at B//2 so the grid always has >= 2 steps (megacore
    sharding on v7x + step-to-step DMA/compute pipelining).  target_rows ~2048
    keeps per-step overhead and DMA ramp amortized on v6e / v5e.
    """
    lane = 128
    pad = lambda x: -(-x // lane) * lane
    hp, h2p, ep = pad(H), pad(2 * H), pad(E)
    # Dominant live per-edge-row VMEM (f32 unless noted): pre1/e1, edge_feat,
    # c1, c2 (4*H), fused ea projection (2H), masked bf16 ea copy + a
    # double-buffered bf16 ea input block (3 * E bf16), lane-padded.
    per_row = (4 * hp + h2p) * 4 + 3 * ep * 2
    rows_fit = max(N * N, vmem_budget_bytes // per_row)
    rows = min(target_rows, rows_fit)
    tb = max(1, min(rows // (N * N), max(1, B // 2)))
    while B % tb:
        tb -= 1
    return tb


def _rep_spec(arr):
    # Replicated (grid-invariant) block: full array, constant index map.
    # TODO(synk): pipeline_mode=pl.Buffered(1) would drop the second VMEM copy
    # of each weight; negligible at H=32, relevant for production H/L on v7x.
    nd = arr.ndim
    return pl.BlockSpec(arr.shape, lambda b: (0,) * nd)


def egnn_forward(params, h0, x0, edge_attr_raw, mask, norm_constant=1.0,
                 block_b=None):
    B, N, Cin = h0.shape
    D = x0.shape[-1]
    H = params["emb_in_w"].shape[1]
    Cout = params["emb_out_w"].shape[1]
    L = params["we1"].shape[0]

    # One-time glue (outside the fused layer loop): distance embedding from the
    # raw coordinates, concatenated onto edge_attr, pre-flattened + bf16.
    cdiff0 = x0[:, :, None, :] - x0[:, None, :, :]
    radial0 = jnp.sum(cdiff0 * cdiff0, axis=-1, keepdims=True)
    edge_attr = jnp.concatenate(
        [edge_attr_raw, sinusoid_embed(radial0)], axis=-1)
    E = edge_attr.shape[-1]
    ea_flat = edge_attr.reshape(B, N * N, E).astype(jnp.bfloat16)

    mask_col = mask[:, :, None]
    mask_row = mask[:, None, :]
    mask_edge = (mask[:, :, None] * mask[:, None, :]).reshape(B, N * N, 1)

    # Host-side fused per-layer weights (wide MXU outputs, no in-kernel slicing).
    we1, wn1, wc1 = params["we1"], params["wn1"], params["wc1"]
    w_h3 = jnp.concatenate([we1[:, :H], we1[:, H:2 * H], wn1[:, :H]], axis=-1)
    w_ea = jnp.concatenate([we1[:, 2 * H:], wc1[:, 2 * H:]], axis=-1)
    w_hc = jnp.concatenate([wc1[:, :H], wc1[:, H:2 * H]], axis=-1)
    wn1a = wn1[:, H:]

    if block_b is None:
        block_b = _pick_block_b(B, N, H, E)
    grid = (B // block_b,)

    kernel = functools.partial(_egnn_kernel, norm_constant=norm_constant)

    data_specs = [
        pl.BlockSpec((block_b, N, 1), lambda b: (b, 0, 0)),        # mask_col
        pl.BlockSpec((block_b, 1, N), lambda b: (b, 0, 0)),        # mask_row
        pl.BlockSpec((block_b, N * N, 1), lambda b: (b, 0, 0)),    # mask_edge
        pl.BlockSpec((block_b, N, Cin), lambda b: (b, 0, 0)),      # h0
        pl.BlockSpec((block_b, N, D), lambda b: (b, 0, 0)),        # x0
        pl.BlockSpec((block_b, N * N, E), lambda b: (b, 0, 0)),    # edge_attr
    ]
    weights = [
        params["emb_in_w"], params["emb_in_b"],
        params["emb_out_w"], params["emb_out_b"],
        w_h3, w_ea, w_hc, wn1a,
        params["we2"], params["wn2"], params["wc2"], params["wc3"],
        params["be1"], params["be2"], params["bn1"], params["bn2"],
        params["bc1"], params["bc2"],
    ]
    in_specs = data_specs + [_rep_spec(w) for w in weights]
    out_specs = (
        pl.BlockSpec((block_b, N, Cout), lambda b: (b, 0, 0)),
        pl.BlockSpec((block_b, N, D), lambda b: (b, 0, 0)),
    )

    # Advisory cost estimate for the XLA scheduler around the fused call.
    rows, nodes = B * N * N, B * N
    mxu = 2 * L * (rows * (E * 2 * H + 2 * H * H)
                   + nodes * (3 * H * H + H * H + H * H + 2 * H * H)
                   + 2 * B * N * N * D)
    flops = mxu + 2 * nodes * (Cin * H + H * Cout) + L * rows * 12 * H
    transcendentals = L * rows * (4 * H + 2)
    nbytes = lambda a: a.size * a.dtype.itemsize
    bytes_accessed = (sum(nbytes(a) for a in weights)
                      + nbytes(ea_flat) + nbytes(h0) + nbytes(x0)
                      + nbytes(mask_col) + nbytes(mask_row) + nbytes(mask_edge)
                      + nodes * Cout * 4 + nodes * D * 4)

    return pl.pallas_call(
        kernel,
        out_shape=(
            jax.ShapeDtypeStruct((B, N, Cout), jnp.float32),
            jax.ShapeDtypeStruct((B, N, D), jnp.float32),
        ),
        grid=grid,
        in_specs=in_specs,
        out_specs=out_specs,
        compiler_params=pltpu.CompilerParams(
            dimension_semantics=("parallel",),
            vmem_limit_bytes=48 * 1024 * 1024,
        ),
        cost_estimate=pl.CostEstimate(
            flops=int(flops),
            transcendentals=int(transcendentals),
            bytes_accessed=int(bytes_accessed)),
    )(mask_col, mask_row, mask_edge, h0, x0, ea_flat, *weights)


# ----------------------------------------------------------------------------
# Plain-JAX glue: sinusoid embedding + parameter init (weights stacked / layer)
# ----------------------------------------------------------------------------
def sinusoid_embed(radial):
    # TODO(synk): SinusoidsEmbeddingNew source not provided; standard EDM
    # definition (max_res=15, min_res=15/2000, div_factor=4) -> 12 dims.
    n_freq = int(math.log(2000.0, 4.0)) + 1
    freqs = 2.0 * math.pi * (4.0 ** jnp.arange(n_freq, dtype=jnp.float32)) / 15.0
    d = jnp.sqrt(radial + 1e-8)                      # (B, N, N, 1)
    emb = d * freqs                                  # (B, N, N, n_freq)
    return jnp.concatenate([jnp.sin(emb), jnp.cos(emb)], axis=-1)


def _uniform(key, shape, bound):
    return jax.random.uniform(key, shape, jnp.float32, -bound, bound)


def _lin_init(key, fan_in, fan_out):
    scale = 1.0 / math.sqrt(fan_in)
    kw, kb = jax.random.split(key)
    return _uniform(kw, (fan_in, fan_out), scale), _uniform(kb, (1, fan_out), scale)


def init_params(key, in_node_nf, hidden_nf, out_node_nf, edge_dim, n_layers):
    H = hidden_nf
    ie = 2 * H + edge_dim
    keys = jax.random.split(key, 2 + n_layers)
    bf16 = jnp.bfloat16

    params = {}
    w, b = _lin_init(keys[0], in_node_nf, H)
    params["emb_in_w"], params["emb_in_b"] = w.astype(bf16), b
    w, b = _lin_init(keys[1], H, out_node_nf)
    params["emb_out_w"], params["emb_out_b"] = w.astype(bf16), b

    acc = {k: [] for k in ["we1", "be1", "we2", "be2", "wn1", "bn1",
                           "wn2", "bn2", "wc1", "bc1", "wc2", "bc2", "wc3"]}
    for i in range(n_layers):
        k = jax.random.split(keys[2 + i], 7)
        w, b = _lin_init(k[0], ie, H); acc["we1"].append(w); acc["be1"].append(b)
        w, b = _lin_init(k[1], H, H);  acc["we2"].append(w); acc["be2"].append(b)
        w, b = _lin_init(k[2], 2 * H, H); acc["wn1"].append(w); acc["bn1"].append(b)
        w, b = _lin_init(k[3], H, H);  acc["wn2"].append(w); acc["bn2"].append(b)
        w, b = _lin_init(k[4], ie, H); acc["wc1"].append(w); acc["bc1"].append(b)
        w, b = _lin_init(k[5], H, H);  acc["wc2"].append(w); acc["bc2"].append(b)
        bound = 0.001 * math.sqrt(6.0 / (H + 1))     # xavier_uniform, gain=0.001
        acc["wc3"].append(_uniform(k[6], (1, H), bound))

    for name in ["we1", "we2", "wn1", "wn2", "wc1", "wc2"]:
        params[name] = jnp.stack(acc[name]).astype(bf16)     # matmul weights
    for name in ["be1", "be2", "bn1", "bn2", "bc1", "bc2", "wc3"]:
        params[name] = jnp.stack(acc[name])                  # f32
    return params


if __name__ == "__main__":
    B, N, D = 2, 8, 3
    IN_NODE, HIDDEN, OUT_NODE, IN_EDGE, N_LAYERS = 8, 32, 8, 4, 4

    key = jax.random.PRNGKey(0)
    k1, k2, k3, kp = jax.random.split(key, 4)
    h0 = jax.random.normal(k1, (B, N, IN_NODE), jnp.float32)
    x0 = jax.random.normal(k2, (B, N, D), jnp.float32)
    edge_attr = jax.random.normal(k3, (B, N, N, IN_EDGE), jnp.float32)
    mask = jnp.ones((B, N), jnp.float32).at[1, 6:].set(0.0)

    params = init_params(kp, IN_NODE, HIDDEN, OUT_NODE, IN_EDGE + 12, N_LAYERS)

    fwd = jax.jit(functools.partial(egnn_forward, norm_constant=1.0))
    h_out, x_out = fwd(params, h0, x0, edge_attr, mask)
    jax.block_until_ready((h_out, x_out))

    assert h_out.shape == (B, N, OUT_NODE)
    assert x_out.shape == (B, N, D)
    assert bool(jnp.all(jnp.isfinite(h_out))) and bool(jnp.all(jnp.isfinite(x_out)))
    print("KERNEL_OK")
</pallas_src>

<mosaic_0001>
module attributes {stable_mosaic.version = 11 : i64} {
  func.func @_egnn_kernel(%arg0: i32, %arg1: memref<1x8x1xf32, #tpu.memory_space<vmem>>, %arg2: memref<1x1x8xf32, #tpu.memory_space<vmem>>, %arg3: memref<1x64x1xf32, #tpu.memory_space<vmem>>, %arg4: memref<1x8x8xf32, #tpu.memory_space<vmem>>, %arg5: memref<1x8x3xf32, #tpu.memory_space<vmem>>, %arg6: memref<1x64x16xbf16, #tpu.memory_space<vmem>>, %arg7: memref<8x32xbf16, #tpu.memory_space<vmem>>, %arg8: memref<1x32xf32, #tpu.memory_space<vmem>>, %arg9: memref<32x8xbf16, #tpu.memory_space<vmem>>, %arg10: memref<1x8xf32, #tpu.memory_space<vmem>>, %arg11: memref<4x32x96xbf16, #tpu.memory_space<vmem>>, %arg12: memref<4x16x64xbf16, #tpu.memory_space<vmem>>, %arg13: memref<4x32x64xbf16, #tpu.memory_space<vmem>>, %arg14: memref<4x32x32xbf16, #tpu.memory_space<vmem>>, %arg15: memref<4x32x32xbf16, #tpu.memory_space<vmem>>, %arg16: memref<4x32x32xbf16, #tpu.memory_space<vmem>>, %arg17: memref<4x32x32xbf16, #tpu.memory_space<vmem>>, %arg18: memref<4x1x32xf32, #tpu.memory_space<vmem>>, %arg19: memref<4x1x32xf32, #tpu.memory_space<vmem>>, %arg20: memref<4x1x32xf32, #tpu.memory_space<vmem>>, %arg21: memref<4x1x32xf32, #tpu.memory_space<vmem>>, %arg22: memref<4x1x32xf32, #tpu.memory_space<vmem>>, %arg23: memref<4x1x32xf32, #tpu.memory_space<vmem>>, %arg24: memref<4x1x32xf32, #tpu.memory_space<vmem>>, %arg25: memref<1x8x8xf32, #tpu.memory_space<vmem>>, %arg26: memref<1x8x3xf32, #tpu.memory_space<vmem>>) attributes {dimension_semantics = [#tpu.dimension_semantics<parallel>], iteration_bounds = array<i64: 2>, scalar_prefetch = 0 : i64, scratch_operands = 0 : i64, tpu.core_type = #tpu.core_type<tc>, window_params = [{transform_indices = @transform_0, window_bounds = array<i64: 1, 8, 1>}, {transform_indices = @transform_1, window_bounds = array<i64: 1, 1, 8>}, {transform_indices = @transform_2, window_bounds = array<i64: 1, 64, 1>}, {transform_indices = @transform_3, window_bounds = array<i64: 1, 8, 8>}, {transform_indices = @transform_4, window_bounds = array<i64: 1, 8, 3>}, {transform_indices = @transform_5, window_bounds = array<i64: 1, 64, 16>}, {pipeline_mode = #tpu.pipeline_mode<synchronous>, transform_indices = @transform_6, window_bounds = array<i64: 8, 32>}, {pipeline_mode = #tpu.pipeline_mode<synchronous>, transform_indices = @transform_7, window_bounds = array<i64: 1, 32>}, {pipeline_mode = #tpu.pipeline_mode<synchronous>, transform_indices = @transform_8, window_bounds = array<i64: 32, 8>}, {pipeline_mode = #tpu.pipeline_mode<synchronous>, transform_indices = @transform_9, window_bounds = array<i64: 1, 8>}, {pipeline_mode = #tpu.pipeline_mode<synchronous>, transform_indices = @transform_10, window_bounds = array<i64: 4, 32, 96>}, {pipeline_mode = #tpu.pipeline_mode<synchronous>, transform_indices = @transform_11, window_bounds = array<i64: 4, 16, 64>}, {pipeline_mode = #tpu.pipeline_mode<synchronous>, transform_indices = @transform_12, window_bounds = array<i64: 4, 32, 64>}, {pipeline_mode = #tpu.pipeline_mode<synchronous>, transform_indices = @transform_13, window_bounds = array<i64: 4, 32, 32>}, {pipeline_mode = #tpu.pipeline_mode<synchronous>, transform_indices = @transform_14, window_bounds = array<i64: 4, 32, 32>}, {pipeline_mode = #tpu.pipeline_mode<synchronous>, transform_indices = @transform_15, window_bounds = array<i64: 4, 32, 32>}, {pipeline_mode = #tpu.pipeline_mode<synchronous>, transform_indices = @transform_16, window_bounds = array<i64: 4, 32, 32>}, {pipeline_mode = #tpu.pipeline_mode<synchronous>, transform_indices = @transform_17, window_bounds = array<i64: 4, 1, 32>}, {pipeline_mode = #tpu.pipeline_mode<synchronous>, transform_indices = @transform_18, window_bounds = array<i64: 4, 1, 32>}, {pipeline_mode = #tpu.pipeline_mode<synchronous>, transform_indices = @transform_19, window_bounds = array<i64: 4, 1, 32>}, {pipeline_mode = #tpu.pipeline_mode<synchronous>, transform_indices = @transform_20, window_bounds = array<i64: 4, 1, 32>}, {pipeline_mode = #tpu.pipeline_mode<synchronous>, transform_indices = @transform_21, window_bounds = array<i64: 4, 1, 32>}, {pipeline_mode = #tpu.pipeline_mode<synchronous>, transform_indices = @transform_22, window_bounds = array<i64: 4, 1, 32>}, {pipeline_mode = #tpu.pipeline_mode<synchronous>, transform_indices = @transform_23, window_bounds = array<i64: 4, 1, 32>}, {transform_indices = @transform_24, window_bounds = array<i64: 1, 8, 8>}, {transform_indices = @transform_25, window_bounds = array<i64: 1, 8, 3>}]} {
    %c0 = arith.constant 0 : index
    %c0_0 = arith.constant 0 : index
    %c0_1 = arith.constant 0 : index
    %0 = vector.load %arg1[%c0, %c0_0, %c0_1] : memref<1x8x1xf32, #tpu.memory_space<vmem>>, vector<1x8x1xf32>
    %c0_2 = arith.constant 0 : index
    %c0_3 = arith.constant 0 : index
    %c0_4 = arith.constant 0 : index
    %1 = vector.load %arg2[%c0_2, %c0_3, %c0_4] : memref<1x1x8xf32, #tpu.memory_space<vmem>>, vector<1x1x8xf32>
    %2 = vector.broadcast %0 : vector<1x8x1xf32> to vector<1x8x8xf32>
    %3 = vector.broadcast %1 : vector<1x1x8xf32> to vector<1x8x8xf32>
    %4 = arith.mulf %2, %3 : vector<1x8x8xf32>
    %c0_5 = arith.constant 0 : index
    %c0_6 = arith.constant 0 : index
    %c0_7 = arith.constant 0 : index
    %5 = vector.load %arg3[%c0_5, %c0_6, %c0_7] : memref<1x64x1xf32, #tpu.memory_space<vmem>>, vector<1x64x1xf32>
    %6 = vector.shape_cast %5 : vector<1x64x1xf32> to vector<64x1xf32>
    %c0_8 = arith.constant 0 : index
    %c0_9 = arith.constant 0 : index
    %c0_10 = arith.constant 0 : index
    %7 = vector.load %arg4[%c0_8, %c0_9, %c0_10] : memref<1x8x8xf32, #tpu.memory_space<vmem>>, vector<1x8x8xf32>
    %8 = vector.shape_cast %7 : vector<1x8x8xf32> to vector<8x8xf32>
    %9 = arith.truncf %8 : vector<8x8xf32> to vector<8x8xbf16>
    %c0_11 = arith.constant 0 : index
    %c0_12 = arith.constant 0 : index
    %10 = vector.load %arg7[%c0_11, %c0_12] : memref<8x32xbf16, #tpu.memory_space<vmem>>, vector<8x32xbf16>
    %cst = arith.constant dense<0.000000e+00> : vector<8x32xf32>
    %11 = tpu.matmul %9, %10, %cst {dimension_numbers = #tpu.dot_dimension_numbers<[1], [0], [0], [1], [0, 0, 1, 1], [], []>} : vector<8x8xbf16>, vector<8x32xbf16>, vector<8x32xf32> -> vector<8x32xf32>
    %c0_13 = arith.constant 0 : index
    %c0_14 = arith.constant 0 : index
    %12 = vector.load %arg8[%c0_13, %c0_14] : memref<1x32xf32, #tpu.memory_space<vmem>>, vector<1x32xf32>
    %13 = vector.broadcast %12 : vector<1x32xf32> to vector<8x32xf32>
    %14 = arith.addf %11, %13 : vector<8x32xf32>
    %15 = vector.shape_cast %14 : vector<8x32xf32> to vector<1x8x32xf32>
    %c0_15 = arith.constant 0 : index
    %c0_16 = arith.constant 0 : index
    %c0_17 = arith.constant 0 : index
    %16 = vector.load %arg5[%c0_15, %c0_16, %c0_17] : memref<1x8x3xf32, #tpu.memory_space<vmem>>, vector<1x8x3xf32>
    %c0_18 = arith.constant 0 : index
    %c0_19 = arith.constant 0 : index
    %c0_20 = arith.constant 0 : index
    %17 = vector.load %arg6[%c0_18, %c0_19, %c0_20] : memref<1x64x16xbf16, #tpu.memory_space<vmem>>, vector<1x64x16xbf16>
    %18 = vector.shape_cast %17 : vector<1x64x16xbf16> to vector<64x16xbf16>
    %19 = arith.extf %18 : vector<64x16xbf16> to vector<64x16xf32>
    %20 = vector.broadcast %6 : vector<64x1xf32> to vector<64x16xf32>
    %21 = arith.mulf %19, %20 : vector<64x16xf32>
    %22 = arith.truncf %21 : vector<64x16xf32> to vector<64x16xbf16>
    %c0_i32 = arith.constant 0 : i32
    %c4_i32 = arith.constant 4 : i32
    %23 = arith.addi %c0_i32, %c4_i32 : i32
    %c1_i32 = arith.constant 1 : i32
    %24:2 = scf.for %arg27 = %c0_i32 to %23 step %c1_i32 iter_args(%arg28 = %15, %arg29 = %16) -> (vector<1x8x32xf32>, vector<1x8x3xf32>)  : i32 {
      %35 = vector.broadcast %0 : vector<1x8x1xf32> to vector<1x8x32xf32>
      %36 = arith.mulf %arg28, %35 : vector<1x8x32xf32>
      %37 = vector.broadcast %0 : vector<1x8x1xf32> to vector<1x8x3xf32>
      %38 = arith.mulf %arg29, %37 : vector<1x8x3xf32>
      %39 = arith.mulf %38, %38 : vector<1x8x3xf32>
      %cst_33 = arith.constant dense<0.000000e+00> : vector<1x8xf32>
      %40 = vector.multi_reduction <add>, %39, %cst_33 [2] : vector<1x8x3xf32> to vector<1x8xf32>
      "tpu.trace_start"() <{level = 10 : i32, message = "bid,bjd->bij"}> : () -> ()
      %cst_34 = arith.constant dense<0.000000e+00> : vector<1x8x8xf32>
      %41 = tpu.matmul %38, %38, %cst_34 {dimension_numbers = #tpu.dot_dimension_numbers<[2], [2], [1], [1], [0, 0, 0, 1, 1, 1], [0], [0]>} : vector<1x8x3xf32>, vector<1x8x3xf32>, vector<1x8x8xf32> -> vector<1x8x8xf32>
      "tpu.trace_stop"() : () -> ()
      %42 = vector.shape_cast %40 : vector<1x8xf32> to vector<1x8x1xf32>
      %43 = vector.shape_cast %40 : vector<1x8xf32> to vector<1x1x8xf32>
      %44 = vector.broadcast %42 : vector<1x8x1xf32> to vector<1x8x8xf32>
      %45 = vector.broadcast %43 : vector<1x1x8xf32> to vector<1x8x8xf32>
      %46 = arith.addf %44, %45 : vector<1x8x8xf32>
      %cst_35 = arith.constant 2.000000e+00 : f32
      %47 = vector.broadcast %cst_35 : f32 to vector<1x8x8xf32>
      %48 = arith.mulf %47, %41 : vector<1x8x8xf32>
      %49 = arith.subf %46, %48 : vector<1x8x8xf32>
      %cst_36 = arith.constant 0.000000e+00 : f32
      %50 = vector.broadcast %cst_36 : f32 to vector<1x8x8xf32>
      %51 = arith.maximumf %49, %50 : vector<1x8x8xf32>
      %cst_37 = arith.constant 9.99999993E-9 : f32
      %52 = vector.broadcast %cst_37 : f32 to vector<1x8x8xf32>
      %53 = arith.addf %51, %52 : vector<1x8x8xf32>
      %54 = math.sqrt %53 : vector<1x8x8xf32>
      %cst_38 = arith.constant 1.000000e+00 : f32
      %55 = vector.broadcast %cst_38 : f32 to vector<1x8x8xf32>
      %56 = arith.addf %54, %55 : vector<1x8x8xf32>
      %cst_39 = arith.constant 1.000000e+00 : f32
      %57 = vector.broadcast %cst_39 : f32 to vector<1x8x8xf32>
      %58 = arith.divf %57, %56 : vector<1x8x8xf32>
      %59 = vector.shape_cast %36 : vector<1x8x32xf32> to vector<8x32xf32>
      %60 = arith.truncf %59 : vector<8x32xf32> to vector<8x32xbf16>
      %61 = arith.index_cast %arg27 : i32 to index
      %c0_40 = arith.constant 0 : index
      %c0_41 = arith.constant 0 : index
      %62 = vector.load %arg11[%61, %c0_40, %c0_41] : memref<4x32x96xbf16, #tpu.memory_space<vmem>>, vector<1x32x96xbf16>
      %63 = vector.shape_cast %62 : vector<1x32x96xbf16> to vector<32x96xbf16>
      %cst_42 = arith.constant dense<0.000000e+00> : vector<8x96xf32>
      %64 = tpu.matmul %60, %63, %cst_42 {dimension_numbers = #tpu.dot_dimension_numbers<[1], [0], [0], [1], [0, 0, 1, 1], [], []>} : vector<8x32xbf16>, vector<32x96xbf16>, vector<8x96xf32> -> vector<8x96xf32>
      %65 = vector.extract_strided_slice %64 {offsets = [0, 0], sizes = [8, 32], strides = [1, 1]} : vector<8x96xf32> to vector<8x32xf32>
      %66 = vector.shape_cast %65 : vector<8x32xf32> to vector<1x8x32xf32>
      %67 = vector.extract_strided_slice %64 {offsets = [0, 32], sizes = [8, 32], strides = [1, 1]} : vector<8x96xf32> to vector<8x32xf32>
      %68 = vector.shape_cast %67 : vector<8x32xf32> to vector<1x8x32xf32>
      %69 = vector.extract_strided_slice %64 {offsets = [0, 64], sizes = [8, 32], strides = [1, 1]} : vector<8x96xf32> to vector<8x32xf32>
      %70 = arith.index_cast %arg27 : i32 to index
      %c0_43 = arith.constant 0 : index
      %c0_44 = arith.constant 0 : index
      %71 = vector.load %arg12[%70, %c0_43, %c0_44] : memref<4x16x64xbf16, #tpu.memory_space<vmem>>, vector<1x16x64xbf16>
      %72 = vector.shape_cast %71 : vector<1x16x64xbf16> to vector<16x64xbf16>
      %cst_45 = arith.constant dense<0.000000e+00> : vector<64x64xf32>
      %73 = tpu.matmul %22, %72, %cst_45 {dimension_numbers = #tpu.dot_dimension_numbers<[1], [0], [0], [1], [0, 0, 1, 1], [], []>} : vector<64x16xbf16>, vector<16x64xbf16>, vector<64x64xf32> -> vector<64x64xf32>
      %74 = vector.extract_strided_slice %73 {offsets = [0, 0], sizes = [64, 32], strides = [1, 1]} : vector<64x64xf32> to vector<64x32xf32>
      %75 = vector.shape_cast %74 : vector<64x32xf32> to vector<1x8x8x32xf32>
      %76 = vector.extract_strided_slice %73 {offsets = [0, 32], sizes = [64, 32], strides = [1, 1]} : vector<64x64xf32> to vector<64x32xf32>
      %77 = vector.shape_cast %76 : vector<64x32xf32> to vector<1x8x8x32xf32>
      %78 = vector.shape_cast %66 : vector<1x8x32xf32> to vector<1x1x8x32xf32>
      %79 = vector.broadcast %78 : vector<1x1x8x32xf32> to vector<1x8x8x32xf32>
      %80 = arith.addf %75, %79 : vector<1x8x8x32xf32>
      %81 = vector.shape_cast %68 : vector<1x8x32xf32> to vector<1x8x1x32xf32>
      %82 = vector.broadcast %81 : vector<1x8x1x32xf32> to vector<1x8x8x32xf32>
      %83 = arith.addf %80, %82 : vector<1x8x8x32xf32>
      %84 = arith.index_cast %arg27 : i32 to index
      %c0_46 = arith.constant 0 : index
      %c0_47 = arith.constant 0 : index
      %85 = vector.load %arg19[%84, %c0_46, %c0_47] : memref<4x1x32xf32, #tpu.memory_space<vmem>>, vector<1x1x32xf32>
      %86 = vector.shape_cast %85 : vector<1x1x32xf32> to vector<1x32xf32>
      %87 = vector.shape_cast %86 : vector<1x32xf32> to vector<1x1x1x32xf32>
      %88 = vector.broadcast %87 : vector<1x1x1x32xf32> to vector<1x8x8x32xf32>
      %89 = arith.addf %83, %88 : vector<1x8x8x32xf32>
      %cst_48 = arith.constant 5.000000e-01 : f32
      %90 = vector.broadcast %cst_48 : f32 to vector<1x8x8x32xf32>
      %91 = arith.mulf %90, %89 : vector<1x8x8x32xf32>
      %cst_49 = arith.constant 5.000000e-01 : f32
      %92 = vector.broadcast %cst_49 : f32 to vector<1x8x8x32xf32>
      %93 = arith.mulf %92, %89 : vector<1x8x8x32xf32>
      %94 = math.tanh %93 : vector<1x8x8x32xf32>
      %cst_50 = arith.constant 1.000000e+00 : f32
      %95 = vector.broadcast %cst_50 : f32 to vector<1x8x8x32xf32>
      %96 = arith.addf %94, %95 : vector<1x8x8x32xf32>
      %97 = arith.mulf %91, %96 : vector<1x8x8x32xf32>
      %98 = vector.shape_cast %97 : vector<1x8x8x32xf32> to vector<64x32xf32>
      %99 = arith.truncf %98 : vector<64x32xf32> to vector<64x32xbf16>
      %100 = arith.index_cast %arg27 : i32 to index
      %c0_51 = arith.constant 0 : index
      %c0_52 = arith.constant 0 : index
      %101 = vector.load %arg15[%100, %c0_51, %c0_52] : memref<4x32x32xbf16, #tpu.memory_space<vmem>>, vector<1x32x32xbf16>
      %102 = vector.shape_cast %101 : vector<1x32x32xbf16> to vector<32x32xbf16>
      %cst_53 = arith.constant dense<0.000000e+00> : vector<64x32xf32>
      %103 = tpu.matmul %99, %102, %cst_53 {dimension_numbers = #tpu.dot_dimension_numbers<[1], [0], [0], [1], [0, 0, 1, 1], [], []>} : vector<64x32xbf16>, vector<32x32xbf16>, vector<64x32xf32> -> vector<64x32xf32>
      %104 = arith.index_cast %arg27 : i32 to index
      %c0_54 = arith.constant 0 : index
      %c0_55 = arith.constant 0 : index
      %105 = vector.load %arg20[%104, %c0_54, %c0_55] : memref<4x1x32xf32, #tpu.memory_space<vmem>>, vector<1x1x32xf32>
      %106 = vector.shape_cast %105 : vector<1x1x32xf32> to vector<1x32xf32>
      %107 = vector.broadcast %106 : vector<1x32xf32> to vector<64x32xf32>
      %108 = arith.addf %103, %107 : vector<64x32xf32>
      %cst_56 = arith.constant 5.000000e-01 : f32
      %109 = vector.broadcast %cst_56 : f32 to vector<64x32xf32>
      %110 = arith.mulf %109, %108 : vector<64x32xf32>
      %cst_57 = arith.constant 5.000000e-01 : f32
      %111 = vector.broadcast %cst_57 : f32 to vector<64x32xf32>
      %112 = arith.mulf %111, %108 : vector<64x32xf32>
      %113 = math.tanh %112 : vector<64x32xf32>
      %cst_58 = arith.constant 1.000000e+00 : f32
      %114 = vector.broadcast %cst_58 : f32 to vector<64x32xf32>
      %115 = arith.addf %113, %114 : vector<64x32xf32>
      %116 = arith.mulf %110, %115 : vector<64x32xf32>
      %117 = vector.broadcast %6 : vector<64x1xf32> to vector<64x32xf32>
      %118 = arith.mulf %116, %117 : vector<64x32xf32>
      %119 = vector.shape_cast %118 : vector<64x32xf32> to vector<8x8x32xf32>
      %cst_59 = arith.constant dense<0.000000e+00> : vector<8x32xf32>
      %120 = vector.multi_reduction <add>, %119, %cst_59 [1] : vector<8x8x32xf32> to vector<8x32xf32>
      %121 = arith.truncf %120 : vector<8x32xf32> to vector<8x32xbf16>
      %122 = arith.index_cast %arg27 : i32 to index
      %c0_60 = arith.constant 0 : index
      %c0_61 = arith.constant 0 : index
      %123 = vector.load %arg14[%122, %c0_60, %c0_61] : memref<4x32x32xbf16, #tpu.memory_space<vmem>>, vector<1x32x32xbf16>
      %124 = vector.shape_cast %123 : vector<1x32x32xbf16> to vector<32x32xbf16>
      %cst_62 = arith.constant dense<0.000000e+00> : vector<8x32xf32>
      %125 = tpu.matmul %121, %124, %cst_62 {dimension_numbers = #tpu.dot_dimension_numbers<[1], [0], [0], [1], [0, 0, 1, 1], [], []>} : vector<8x32xbf16>, vector<32x32xbf16>, vector<8x32xf32> -> vector<8x32xf32>
      %126 = arith.addf %69, %125 : vector<8x32xf32>
      %127 = arith.index_cast %arg27 : i32 to index
      %c0_63 = arith.constant 0 : index
      %c0_64 = arith.constant 0 : index
      %128 = vector.load %arg21[%127, %c0_63, %c0_64] : memref<4x1x32xf32, #tpu.memory_space<vmem>>, vector<1x1x32xf32>
      %129 = vector.shape_cast %128 : vector<1x1x32xf32> to vector<1x32xf32>
      %130 = vector.broadcast %129 : vector<1x32xf32> to vector<8x32xf32>
      %131 = arith.addf %126, %130 : vector<8x32xf32>
      %cst_65 = arith.constant 5.000000e-01 : f32
      %132 = vector.broadcast %cst_65 : f32 to vector<8x32xf32>
      %133 = arith.mulf %132, %131 : vector<8x32xf32>
      %cst_66 = arith.constant 5.000000e-01 : f32
      %134 = vector.broadcast %cst_66 : f32 to vector<8x32xf32>
      %135 = arith.mulf %134, %131 : vector<8x32xf32>
      %136 = math.tanh %135 : vector<8x32xf32>
      %cst_67 = arith.constant 1.000000e+00 : f32
      %137 = vector.broadcast %cst_67 : f32 to vector<8x32xf32>
      %138 = arith.addf %136, %137 : vector<8x32xf32>
      %139 = arith.mulf %133, %138 : vector<8x32xf32>
      %140 = arith.truncf %139 : vector<8x32xf32> to vector<8x32xbf16>
      %141 = arith.index_cast %arg27 : i32 to index
      %c0_68 = arith.constant 0 : index
      %c0_69 = arith.constant 0 : index
      %142 = vector.load %arg16[%141, %c0_68, %c0_69] : memref<4x32x32xbf16, #tpu.memory_space<vmem>>, vector<1x32x32xbf16>
      %143 = vector.shape_cast %142 : vector<1x32x32xbf16> to vector<32x32xbf16>
      %cst_70 = arith.constant dense<0.000000e+00> : vector<8x32xf32>
      %144 = tpu.matmul %140, %143, %cst_70 {dimension_numbers = #tpu.dot_dimension_numbers<[1], [0], [0], [1], [0, 0, 1, 1], [], []>} : vector<8x32xbf16>, vector<32x32xbf16>, vector<8x32xf32> -> vector<8x32xf32>
      %145 = arith.index_cast %arg27 : i32 to index
      %c0_71 = arith.constant 0 : index
      %c0_72 = arith.constant 0 : index
      %146 = vector.load %arg22[%145, %c0_71, %c0_72] : memref<4x1x32xf32, #tpu.memory_space<vmem>>, vector<1x1x32xf32>
      %147 = vector.shape_cast %146 : vector<1x1x32xf32> to vector<1x32xf32>
      %148 = vector.broadcast %147 : vector<1x32xf32> to vector<8x32xf32>
      %149 = arith.addf %144, %148 : vector<8x32xf32>
      %150 = vector.shape_cast %149 : vector<8x32xf32> to vector<1x8x32xf32>
      %151 = arith.addf %36, %150 : vector<1x8x32xf32>
      %152 = vector.broadcast %0 : vector<1x8x1xf32> to vector<1x8x32xf32>
      %153 = arith.mulf %151, %152 : vector<1x8x32xf32>
      %154 = vector.shape_cast %153 : vector<1x8x32xf32> to vector<8x32xf32>
      %155 = arith.truncf %154 : vector<8x32xf32> to vector<8x32xbf16>
      %156 = arith.index_cast %arg27 : i32 to index
      %c0_73 = arith.constant 0 : index
      %c0_74 = arith.constant 0 : index
      %157 = vector.load %arg13[%156, %c0_73, %c0_74] : memref<4x32x64xbf16, #tpu.memory_space<vmem>>, vector<1x32x64xbf16>
      %158 = vector.shape_cast %157 : vector<1x32x64xbf16> to vector<32x64xbf16>
      %cst_75 = arith.constant dense<0.000000e+00> : vector<8x64xf32>
      %159 = tpu.matmul %155, %158, %cst_75 {dimension_numbers = #tpu.dot_dimension_numbers<[1], [0], [0], [1], [0, 0, 1, 1], [], []>} : vector<8x32xbf16>, vector<32x64xbf16>, vector<8x64xf32> -> vector<8x64xf32>
      %160 = vector.extract_strided_slice %159 {offsets = [0, 0], sizes = [8, 32], strides = [1, 1]} : vector<8x64xf32> to vector<8x32xf32>
      %161 = vector.shape_cast %160 : vector<8x32xf32> to vector<1x8x32xf32>
      %162 = vector.extract_strided_slice %159 {offsets = [0, 32], sizes = [8, 32], strides = [1, 1]} : vector<8x64xf32> to vector<8x32xf32>
      %163 = vector.shape_cast %162 : vector<8x32xf32> to vector<1x8x32xf32>
      %164 = vector.shape_cast %161 : vector<1x8x32xf32> to vector<1x1x8x32xf32>
      %165 = vector.broadcast %164 : vector<1x1x8x32xf32> to vector<1x8x8x32xf32>
      %166 = arith.addf %77, %165 : vector<1x8x8x32xf32>
      %167 = vector.shape_cast %163 : vector<1x8x32xf32> to vector<1x8x1x32xf32>
      %168 = vector.broadcast %167 : vector<1x8x1x32xf32> to vector<1x8x8x32xf32>
      %169 = arith.addf %166, %168 : vector<1x8x8x32xf32>
      %170 = arith.index_cast %arg27 : i32 to index
      %c0_76 = arith.constant 0 : index
      %c0_77 = arith.constant 0 : index
      %171 = vector.load %arg23[%170, %c0_76, %c0_77] : memref<4x1x32xf32, #tpu.memory_space<vmem>>, vector<1x1x32xf32>
      %172 = vector.shape_cast %171 : vector<1x1x32xf32> to vector<1x32xf32>
      %173 = vector.shape_cast %172 : vector<1x32xf32> to vector<1x1x1x32xf32>
      %174 = vector.broadcast %173 : vector<1x1x1x32xf32> to vector<1x8x8x32xf32>
      %175 = arith.addf %169, %174 : vector<1x8x8x32xf32>
      %cst_78 = arith.constant 5.000000e-01 : f32
      %176 = vector.broadcast %cst_78 : f32 to vector<1x8x8x32xf32>
      %177 = arith.mulf %176, %175 : vector<1x8x8x32xf32>
      %cst_79 = arith.constant 5.000000e-01 : f32
      %178 = vector.broadcast %cst_79 : f32 to vector<1x8x8x32xf32>
      %179 = arith.mulf %178, %175 : vector<1x8x8x32xf32>
      %180 = math.tanh %179 : vector<1x8x8x32xf32>
      %cst_80 = arith.constant 1.000000e+00 : f32
      %181 = vector.broadcast %cst_80 : f32 to vector<1x8x8x32xf32>
      %182 = arith.addf %180, %181 : vector<1x8x8x32xf32>
      %183 = arith.mulf %177, %182 : vector<1x8x8x32xf32>
      %184 = vector.shape_cast %183 : vector<1x8x8x32xf32> to vector<64x32xf32>
      %185 = arith.truncf %184 : vector<64x32xf32> to vector<64x32xbf16>
      %186 = arith.index_cast %arg27 : i32 to index
      %c0_81 = arith.constant 0 : index
      %c0_82 = arith.constant 0 : index
      %187 = vector.load %arg17[%186, %c0_81, %c0_82] : memref<4x32x32xbf16, #tpu.memory_space<vmem>>, vector<1x32x32xbf16>
      %188 = vector.shape_cast %187 : vector<1x32x32xbf16> to vector<32x32xbf16>
      %cst_83 = arith.constant dense<0.000000e+00> : vector<64x32xf32>
      %189 = tpu.matmul %185, %188, %cst_83 {dimension_numbers = #tpu.dot_dimension_numbers<[1], [0], [0], [1], [0, 0, 1, 1], [], []>} : vector<64x32xbf16>, vector<32x32xbf16>, vector<64x32xf32> -> vector<64x32xf32>
      %190 = arith.index_cast %arg27 : i32 to index
      %c0_84 = arith.constant 0 : index
      %c0_85 = arith.constant 0 : index
      %191 = vector.load %arg24[%190, %c0_84, %c0_85] : memref<4x1x32xf32, #tpu.memory_space<vmem>>, vector<1x1x32xf32>
      %192 = vector.shape_cast %191 : vector<1x1x32xf32> to vector<1x32xf32>
      %193 = vector.broadcast %192 : vector<1x32xf32> to vector<64x32xf32>
      %194 = arith.addf %189, %193 : vector<64x32xf32>
      %cst_86 = arith.constant 5.000000e-01 : f32
      %195 = vector.broadcast %cst_86 : f32 to vector<64x32xf32>
      %196 = arith.mulf %195, %194 : vector<64x32xf32>
      %cst_87 = arith.constant 5.000000e-01 : f32
      %197 = vector.broadcast %cst_87 : f32 to vector<64x32xf32>
      %198 = arith.mulf %197, %194 : vector<64x32xf32>
      %199 = math.tanh %198 : vector<64x32xf32>
      %cst_88 = arith.constant 1.000000e+00 : f32
      %200 = vector.broadcast %cst_88 : f32 to vector<64x32xf32>
      %201 = arith.addf %199, %200 : vector<64x32xf32>
      %202 = arith.mulf %196, %201 : vector<64x32xf32>
      %203 = vector.shape_cast %202 : vector<64x32xf32> to vector<1x8x8x32xf32>
      %204 = arith.index_cast %arg27 : i32 to index
      %c0_89 = arith.constant 0 : index
      %c0_90 = arith.constant 0 : index
      %205 = vector.load %arg18[%204, %c0_89, %c0_90] : memref<4x1x32xf32, #tpu.memory_space<vmem>>, vector<1x1x32xf32>
      %206 = vector.shape_cast %205 : vector<1x1x32xf32> to vector<1x32xf32>
      %207 = vector.shape_cast %206 : vector<1x32xf32> to vector<1x1x1x32xf32>
      %208 = vector.broadcast %207 : vector<1x1x1x32xf32> to vector<1x8x8x32xf32>
      %209 = arith.mulf %203, %208 : vector<1x8x8x32xf32>
      %cst_91 = arith.constant dense<0.000000e+00> : vector<1x8x8xf32>
      %210 = vector.multi_reduction <add>, %209, %cst_91 [3] : vector<1x8x8x32xf32> to vector<1x8x8xf32>
      %211 = arith.mulf %210, %4 : vector<1x8x8xf32>
      %212 = arith.mulf %211, %58 : vector<1x8x8xf32>
      %cst_92 = arith.constant dense<0.000000e+00> : vector<1x8xf32>
      %213 = vector.multi_reduction <add>, %212, %cst_92 [2] : vector<1x8x8xf32> to vector<1x8xf32>
      %214 = vector.shape_cast %213 : vector<1x8xf32> to vector<1x8x1xf32>
      "tpu.trace_start"() <{level = 10 : i32, message = "bij,bjd->bid"}> : () -> ()
      %cst_93 = arith.constant dense<0.000000e+00> : vector<1x8x3xf32>
      %215 = tpu.matmul %212, %38, %cst_93 {dimension_numbers = #tpu.dot_dimension_numbers<[2], [1], [1], [2], [0, 0, 0, 1, 1, 2], [0], [0]>} : vector<1x8x8xf32>, vector<1x8x3xf32>, vector<1x8x3xf32> -> vector<1x8x3xf32>
      "tpu.trace_stop"() : () -> ()
      %216 = vector.broadcast %214 : vector<1x8x1xf32> to vector<1x8x3xf32>
      %217 = arith.mulf %38, %216 : vector<1x8x3xf32>
      %218 = arith.addf %38, %217 : vector<1x8x3xf32>
      %219 = arith.subf %218, %215 : vector<1x8x3xf32>
      %220 = vector.broadcast %0 : vector<1x8x1xf32> to vector<1x8x3xf32>
      %221 = arith.mulf %219, %220 : vector<1x8x3xf32>
      scf.yield %153, %221 : vector<1x8x32xf32>, vector<1x8x3xf32>
    }
    %c4_i32_21 = arith.constant 4 : i32
    %25 = vector.shape_cast %24#0 : vector<1x8x32xf32> to vector<8x32xf32>
    %26 = arith.truncf %25 : vector<8x32xf32> to vector<8x32xbf16>
    %c0_22 = arith.constant 0 : index
    %c0_23 = arith.constant 0 : index
    %27 = vector.load %arg9[%c0_22, %c0_23] : memref<32x8xbf16, #tpu.memory_space<vmem>>, vector<32x8xbf16>
    %cst_24 = arith.constant dense<0.000000e+00> : vector<8x8xf32>
    %28 = tpu.matmul %26, %27, %cst_24 {dimension_numbers = #tpu.dot_dimension_numbers<[1], [0], [0], [1], [0, 0, 1, 1], [], []>} : vector<8x32xbf16>, vector<32x8xbf16>, vector<8x8xf32> -> vector<8x8xf32>
    %c0_25 = arith.constant 0 : index
    %c0_26 = arith.constant 0 : index
    %29 = vector.load %arg10[%c0_25, %c0_26] : memref<1x8xf32, #tpu.memory_space<vmem>>, vector<1x8xf32>
    %30 = vector.broadcast %29 : vector<1x8xf32> to vector<8x8xf32>
    %31 = arith.addf %28, %30 : vector<8x8xf32>
    %32 = vector.shape_cast %31 : vector<8x8xf32> to vector<1x8x8xf32>
    %c0_27 = arith.constant 0 : index
    %c0_28 = arith.constant 0 : index
    %c0_29 = arith.constant 0 : index
    %33 = vector.load %arg25[%c0_27, %c0_28, %c0_29] : memref<1x8x8xf32, #tpu.memory_space<vmem>>, vector<1x8x8xf32>
    tpu.vector_store %arg25[%c0_27, %c0_28, %c0_29], %32 {strides = array<i32>} : memref<1x8x8xf32, #tpu.memory_space<vmem>>, vector<1x8x8xf32>,
    %c0_30 = arith.constant 0 : index
    %c0_31 = arith.constant 0 : index
    %c0_32 = arith.constant 0 : index
    %34 = vector.load %arg26[%c0_30, %c0_31, %c0_32] : memref<1x8x3xf32, #tpu.memory_space<vmem>>, vector<1x8x3xf32>
    tpu.vector_store %arg26[%c0_30, %c0_31, %c0_32], %24#1 {strides = array<i32>} : memref<1x8x3xf32, #tpu.memory_space<vmem>>, vector<1x8x3xf32>,
    return
  }
  func.func @transform_0(%arg0: i32) -> (i32, i32, i32) {
    %c0_i32 = arith.constant 0 : i32
    %c0_i32_0 = arith.constant 0 : i32
    %c0_i32_1 = arith.constant 0 : i32
    return %arg0, %c0_i32, %c0_i32_0 : i32, i32, i32
  }
  func.func @transform_1(%arg0: i32) -> (i32, i32, i32) {
    %c0_i32 = arith.constant 0 : i32
    %c0_i32_0 = arith.constant 0 : i32
    %c0_i32_1 = arith.constant 0 : i32
    return %arg0, %c0_i32, %c0_i32_0 : i32, i32, i32
  }
  func.func @transform_2(%arg0: i32) -> (i32, i32, i32) {
    %c0_i32 = arith.constant 0 : i32
    %c0_i32_0 = arith.constant 0 : i32
    %c0_i32_1 = arith.constant 0 : i32
    return %arg0, %c0_i32, %c0_i32_0 : i32, i32, i32
  }
  func.func @transform_3(%arg0: i32) -> (i32, i32, i32) {
    %c0_i32 = arith.constant 0 : i32
    %c0_i32_0 = arith.constant 0 : i32
    %c0_i32_1 = arith.constant 0 : i32
    return %arg0, %c0_i32, %c0_i32_0 : i32, i32, i32
  }
  func.func @transform_4(%arg0: i32) -> (i32, i32, i32) {
    %c0_i32 = arith.constant 0 : i32
    %c0_i32_0 = arith.constant 0 : i32
    %c0_i32_1 = arith.constant 0 : i32
    return %arg0, %c0_i32, %c0_i32_0 : i32, i32, i32
  }
  func.func @transform_5(%arg0: i32) -> (i32, i32, i32) {
    %c0_i32 = arith.constant 0 : i32
    %c0_i32_0 = arith.constant 0 : i32
    %c0_i32_1 = arith.constant 0 : i32
    return %arg0, %c0_i32, %c0_i32_0 : i32, i32, i32
  }
  func.func @transform_6(%arg0: i32) -> (i32, i32) {
    %c0_i32 = arith.constant 0 : i32
    %c0_i32_0 = arith.constant 0 : i32
    %c0_i32_1 = arith.constant 0 : i32
    return %c0_i32, %c0_i32_0 : i32, i32
  }
  func.func @transform_7(%arg0: i32) -> (i32, i32) {
    %c0_i32 = arith.constant 0 : i32
    %c0_i32_0 = arith.constant 0 : i32
    %c0_i32_1 = arith.constant 0 : i32
    return %c0_i32, %c0_i32_0 : i32, i32
  }
  func.func @transform_8(%arg0: i32) -> (i32, i32) {
    %c0_i32 = arith.constant 0 : i32
    %c0_i32_0 = arith.constant 0 : i32
    %c0_i32_1 = arith.constant 0 : i32
    return %c0_i32, %c0_i32_0 : i32, i32
  }
  func.func @transform_9(%arg0: i32) -> (i32, i32) {
    %c0_i32 = arith.constant 0 : i32
    %c0_i32_0 = arith.constant 0 : i32
    %c0_i32_1 = arith.constant 0 : i32
    return %c0_i32, %c0_i32_0 : i32, i32
  }
  func.func @transform_10(%arg0: i32) -> (i32, i32, i32) {
    %c0_i32 = arith.constant 0 : i32
    %c0_i32_0 = arith.constant 0 : i32
    %c0_i32_1 = arith.constant 0 : i32
    %c0_i32_2 = arith.constant 0 : i32
    return %c0_i32, %c0_i32_0, %c0_i32_1 : i32, i32, i32
  }
  func.func @transform_11(%arg0: i32) -> (i32, i32, i32) {
    %c0_i32 = arith.constant 0 : i32
    %c0_i32_0 = arith.constant 0 : i32
    %c0_i32_1 = arith.constant 0 : i32
    %c0_i32_2 = arith.constant 0 : i32
    return %c0_i32, %c0_i32_0, %c0_i32_1 : i32, i32, i32
  }
  func.func @transform_12(%arg0: i32) -> (i32, i32, i32) {
    %c0_i32 = arith.constant 0 : i32
    %c0_i32_0 = arith.constant 0 : i32
    %c0_i32_1 = arith.constant 0 : i32
    %c0_i32_2 = arith.constant 0 : i32
    return %c0_i32, %c0_i32_0, %c0_i32_1 : i32, i32, i32
  }
  func.func @transform_13(%arg0: i32) -> (i32, i32, i32) {
    %c0_i32 = arith.constant 0 : i32
    %c0_i32_0 = arith.constant 0 : i32
    %c0_i32_1 = arith.constant 0 : i32
    %c0_i32_2 = arith.constant 0 : i32
    return %c0_i32, %c0_i32_0, %c0_i32_1 : i32, i32, i32
  }
  func.func @transform_14(%arg0: i32) -> (i32, i32, i32) {
    %c0_i32 = arith.constant 0 : i32
    %c0_i32_0 = arith.constant 0 : i32
    %c0_i32_1 = arith.constant 0 : i32
    %c0_i32_2 = arith.constant 0 : i32
    return %c0_i32, %c0_i32_0, %c0_i32_1 : i32, i32, i32
  }
  func.func @transform_15(%arg0: i32) -> (i32, i32, i32) {
    %c0_i32 = arith.constant 0 : i32
    %c0_i32_0 = arith.constant 0 : i32
    %c0_i32_1 = arith.constant 0 : i32
    %c0_i32_2 = arith.constant 0 : i32
    return %c0_i32, %c0_i32_0, %c0_i32_1 : i32, i32, i32
  }
  func.func @transform_16(%arg0: i32) -> (i32, i32, i32) {
    %c0_i32 = arith.constant 0 : i32
    %c0_i32_0 = arith.constant 0 : i32
    %c0_i32_1 = arith.constant 0 : i32
    %c0_i32_2 = arith.constant 0 : i32
    return %c0_i32, %c0_i32_0, %c0_i32_1 : i32, i32, i32
  }
  func.func @transform_17(%arg0: i32) -> (i32, i32, i32) {
    %c0_i32 = arith.constant 0 : i32
    %c0_i32_0 = arith.constant 0 : i32
    %c0_i32_1 = arith.constant 0 : i32
    %c0_i32_2 = arith.constant 0 : i32
    return %c0_i32, %c0_i32_0, %c0_i32_1 : i32, i32, i32
  }
  func.func @transform_18(%arg0: i32) -> (i32, i32, i32) {
    %c0_i32 = arith.constant 0 : i32
    %c0_i32_0 = arith.constant 0 : i32
    %c0_i32_1 = arith.constant 0 : i32
    %c0_i32_2 = arith.constant 0 : i32
    return %c0_i32, %c0_i32_0, %c0_i32_1 : i32, i32, i32
  }
  func.func @transform_19(%arg0: i32) -> (i32, i32, i32) {
    %c0_i32 = arith.constant 0 : i32
    %c0_i32_0 = arith.constant 0 : i32
    %c0_i32_1 = arith.constant 0 : i32
    %c0_i32_2 = arith.constant 0 : i32
    return %c0_i32, %c0_i32_0, %c0_i32_1 : i32, i32, i32
  }
  func.func @transform_20(%arg0: i32) -> (i32, i32, i32) {
    %c0_i32 = arith.constant 0 : i32
    %c0_i32_0 = arith.constant 0 : i32
    %c0_i32_1 = arith.constant 0 : i32
    %c0_i32_2 = arith.constant 0 : i32
    return %c0_i32, %c0_i32_0, %c0_i32_1 : i32, i32, i32
  }
  func.func @transform_21(%arg0: i32) -> (i32, i32, i32) {
    %c0_i32 = arith.constant 0 : i32
    %c0_i32_0 = arith.constant 0 : i32
    %c0_i32_1 = arith.constant 0 : i32
    %c0_i32_2 = arith.constant 0 : i32
    return %c0_i32, %c0_i32_0, %c0_i32_1 : i32, i32, i32
  }
  func.func @transform_22(%arg0: i32) -> (i32, i32, i32) {
    %c0_i32 = arith.constant 0 : i32
    %c0_i32_0 = arith.constant 0 : i32
    %c0_i32_1 = arith.constant 0 : i32
    %c0_i32_2 = arith.constant 0 : i32
    return %c0_i32, %c0_i32_0, %c0_i32_1 : i32, i32, i32
  }
  func.func @transform_23(%arg0: i32) -> (i32, i32, i32) {
    %c0_i32 = arith.constant 0 : i32
    %c0_i32_0 = arith.constant 0 : i32
    %c0_i32_1 = arith.constant 0 : i32
    %c0_i32_2 = arith.constant 0 : i32
    return %c0_i32, %c0_i32_0, %c0_i32_1 : i32, i32, i32
  }
  func.func @transform_24(%arg0: i32) -> (i32, i32, i32) {
    %c0_i32 = arith.constant 0 : i32
    %c0_i32_0 = arith.constant 0 : i32
    %c0_i32_1 = arith.constant 0 : i32
    return %arg0, %c0_i32, %c0_i32_0 : i32, i32, i32
  }
  func.func @transform_25(%arg0: i32) -> (i32, i32, i32) {
    %c0_i32 = arith.constant 0 : i32
    %c0_i32_0 = arith.constant 0 : i32
    %c0_i32_1 = arith.constant 0 : i32
    return %arg0, %c0_i32, %c0_i32_0 : i32, i32, i32
  }
}

</mosaic_0001>

<bundles_post_ra>
// kernel: egnn_forward.1
= control target key start
LH: loop header
LB: loop body
LE: loop exit
PB: predicated region body
PF: predicated region fallthrough
CT: control target
= control target key end

     0   :  { %s4019_s0 = inlined_call_operand.vmem [shape: f32[2,8,1], index: 0, kind: input, shape index: {}]   ;;  %s4020_s1 = inlined_call_operand.vmem [shape: f32[2,1,8], index: 1, kind: input, shape index: {}]   ;;  %s4021_s2 = inlined_call_operand.vmem [shape: f32[2,64,1], index: 2, kind: input, shape index: {}]   ;;  %s4022_s3 = inlined_call_operand.vmem [shape: f32[2,8,8], index: 3, kind: input, shape index: {}]   ;;  %s4023_s4 = inlined_call_operand.vmem [shape: f32[2,8,3], index: 4, kind: input, shape index: {}]   ;;  %s4024_s5 = inlined_call_operand.vmem [shape: bf16[2,64,16], index: 5, kind: input, shape index: {}]   ;;  %s4025_s6 = inlined_call_operand.vmem [shape: bf16[8,32], index: 6, kind: input, shape index: {}]   ;;  %s4026_s7 = inlined_call_operand.vmem [shape: f32[1,32], index: 7, kind: input, shape index: {}]   ;;  %s4027_s8 = inlined_call_operand.vmem [shape: bf16[32,8], index: 8, kind: input, shape index: {}]   ;;  %s4028_s9 = inlined_call_operand.vmem [shape: f32[1,8], index: 9, kind: input, shape index: {}]   ;;  %s4029_s10 = inlined_call_operand.vmem [shape: bf16[4,32,96], index: 10, kind: input, shape index: {}]   ;;  %s4030_s11 = inlined_call_operand.vmem [shape: bf16[4,16,64], index: 11, kind: input, shape index: {}]   ;;  %s4031_s12 = inlined_call_operand.vmem [shape: bf16[4,32,64], index: 12, kind: input, shape index: {}]   ;;  %s4032_s13 = inlined_call_operand.vmem [shape: bf16[4,32,32], index: 13, kind: input, shape index: {}]   ;;  %s4033_s14 = inlined_call_operand.vmem [shape: bf16[4,32,32], index: 14, kind: input, shape index: {}]   ;;  %s4034_s15 = inlined_call_operand.vmem [shape: bf16[4,32,32], index: 15, kind: input, shape index: {}]   ;;  %s4035_s16 = inlined_call_operand.vmem [shape: bf16[4,32,32], index: 16, kind: input, shape index: {}]   ;;  %s4036_s17 = inlined_call_operand.vmem [shape: f32[4,1,32], index: 17, kind: input, shape index: {}]   ;;  %s4037_s18 = inlined_call_operand.vmem [shape: f32[4,1,32], index: 18, kind: input, shape index: {}]   ;;  %s4038_s19 = inlined_call_operand.vmem [shape: f32[4,1,32], index: 19, kind: input, shape index: {}]   ;;  %s4039_s20 = inlined_call_operand.vmem [shape: f32[4,1,32], index: 20, kind: input, shape index: {}]   ;;  %s4040_s21 = inlined_call_operand.vmem [shape: f32[4,1,32], index: 21, kind: input, shape index: {}]   ;;  %s4041_s22 = inlined_call_operand.vmem [shape: f32[4,1,32], index: 22, kind: input, shape index: {}]   ;;  %s4042_s23 = inlined_call_operand.vmem [shape: f32[4,1,32], index: 23, kind: input, shape index: {}]   ;;  %s4043_s24 = inlined_call_operand.hbm [shape: f32[2,8,8], index: 24, kind: output, shape index: {0}]   ;;  %s4044_s25 = inlined_call_operand.vmem [shape: f32[2,8,3], index: 25, kind: output, shape index: {1}]  }
   0x1   :  { %4064 = sst [smem:[#allocation15_spill]] %s4019_s0 }
   0x2   :  { %4065 = sst [smem:[#allocation16_spill]] %s4020_s1 }
   0x3   :  { %4066 = sst [smem:[#allocation17_spill]] %s4021_s2 }
   0x4   :  { %4067 = sst [smem:[#allocation18_spill]] %s4022_s3 }
   0x5   :  { %4068 = sst [smem:[#allocation19_spill]] %s4023_s4 }
   0x6   :  { %4069 = sst [smem:[#allocation20_spill]] %s4024_s5 }
   0x7   :  { %4070 = sst [smem:[#allocation21_spill]] %s4025_s6 }
   0x8   :  { %4071 = sst [smem:[#allocation22_spill]] %s4026_s7 }
   0x9   :  { %4072 = sst [smem:[#allocation23_spill]] %s4027_s8 }
   0xa   :  { %4073 = sst [smem:[#allocation24_spill]] %s4028_s9 }
   0xb   :  { %4074 = sst [smem:[#allocation25_spill]] %s4035_s16 }
   0xc   :  { %4075 = sst [smem:[#allocation26_spill]] %s4036_s17 }
   0xd   :  { %4076 = sst [smem:[#allocation27_spill]] %s4042_s23 }
   0xe   :  { %4077 = sst [smem:[#allocation28_spill]] %s4043_s24 }
   0xf   :  { %31 = vsyncpa [#allocation3], 0 }
  0x10   :  { %33 = vsyncpa [#allocation3 + $0x1], 0  ;;  %s3439_s29 = smov 0   ;;  %s3441_s2 = smov 0  }
  0x11   :  { %s3443_s6 = smov 0   ;;  %s3445_s30 = smov 0  }
  0x12 LB: > { %4078 = sst [smem:[#allocation5_spill]] %s3272_s29  ;;  %s3460_s7 = sadd.s32 4294967295, %s3284_s30   ;;  %s3284_s30 = sphi %s3445_s30, %s4122_s30   ;;  %s3280_s6 = sphi %s3443_s6, %s4125_s6   ;;  %s3276_s2 = sphi %s3441_s2, %s4124_s2   ;;  %s3272_s29 = sphi %s3439_s29, %s4123_s29  }
  0x13   : > { %4079 = sst [smem:[#allocation6_spill]] %s3276_s2  ;;  %s2820_s3 = sadd.s32 4294967294, %s3284_s30  }
  0x14   : > { %4080 = sst [smem:[#allocation7_spill]] %s3280_s6  ;;  %s3464_s26 = sadd.s32 1, %s3284_s30  }
  0x15   : > { %4081 = sst [smem:[#allocation8_spill]] %s3284_s30  ;;  %s580_s1 = sadd.s32 1, %s3280_s6 }
  0x16   : > { %4082 = sst [smem:[#allocation9_spill]] %s3460_s7  ;;  %s577_s8 = ssub.s32 %s3284_s30, %s3464_s26 }
  0x17   : > { %4083 = sst [smem:[#allocation10_spill]] %s3464_s26  ;;  %p590_p0 = scmp.ne.s32.totalorder %s3280_s6, %s3276_s2 }
  0x18   : > { %p578_p1 = scmp.eq.s32.totalorder %s577_s8, 0  ;;  %p591_p2 = scmp.eq.s32.totalorder %s3460_s7, 1 }
  0x19   : > { %p596_p3 = scmp.ne.s32.totalorder %s3276_s2, %s3272_s29  ;;  %p597_p4 = scmp.eq.s32.totalorder %s2820_s3, 1 }
  0x1a   : > { %s3475_s27 = scalar_select %p578_p1, %s3280_s6, %s580_s1  }
  0x1b   : > { %p3477_p5 = por %p591_p2, %p590_p0  ;;  %p3481_p6 = por %p597_p4, %p596_p3 }
  0x1c   : > { %4084 = sst [smem:[#allocation11_spill]] %s3475_s27  ;;  %p2823_p7 = scmp.ge.s32.totalorder %s3284_s30, 1 }
  0x1d   : > { %s4085_s4 = scalar_select %p3477_p5, 1, 0 }
  0x1e   : > { %s4087_s28 = scalar_select %p3481_p6, 1, 0 }
  0x1f   : > { %4086 = sst [smem:[#allocation12_spill]] %s4085_s4  ;;  %p738_p8 = scmp.lt.s32.totalorder %s3284_s30, 3 }
  0x20   : > { %4088 = sst [smem:[#allocation13_spill]] %s4087_s28 }
  0x21   : > { %p739_p9 = pnand %p2823_p7, %p738_p8 }
  0x23   : > { %742 = sbr.rel (%p739_p9) target bundleno = 2983 (0xba7), region = 116 }
  0x2a   : > { %s4046_s9 = sand.u32 1, %s3276_s2   ;;  %s4089_s3 = sld [smem:[#allocation21_spill]]  ;;  %vm896_vm0 = vcmask 1043456   ;;  %v4058_v1 = vmov 0.0   ;;  %vm3299_vm1 = vmmov 0   ;;  %v3300_v3 = vmov 0  }
  0x2b   : > { %s3493_s1 = sshll.u32 %s4046_s9, 3  ;;  %2958 = vmatprep.subr.bf16.mxu0 %v4058_v1  ;;  %2960 = vmatprep.mubr.msk.bf16.mxu0 %vm3299_vm1, %v4058_v1  ;;  %p830_p10 = scmp.lt.s32.totalorder %s3460_s7, 1  ;;  %vm892_vm2 = vcmask 64512  }
  0x2c   : > { %3121 = vset.pattern.permute.xlu0 %v3300_v3  ;;  %3122 = vset.pattern.permute.xlu1 %v3300_v3  ;;  %s4090_s27 = sld [smem:[#allocation18_spill]]  ;;  %s4091_s29 = sld [smem:[#allocation19_spill]] }
  0x2d   : > { %s3500_s8 = scalar_select %p830_p10, %s3460_s7, 1 }
  0x2e   : > { %s4092_s23 = sld [smem:[#allocation17_spill]]  ;;  %s4093_s24 = sld [smem:[#allocation15_spill]] }
  0x2f   : > { %s3503_s5 = sshll.u32 %s3500_s8, 3  ;;  %s2892_s0 = sshll.u32 %s3500_s8, 6 }
  0x30   : > { %v884_v0 = vld [vmem:[%s4089_s3] sm:$0xf]  ;;  %s858_s2 = scalar_lea.vmem %s4044_s25, %s3503_s5  ;;  %s4094_s26 = sld [smem:[#allocation20_spill]] }
  0x31   : > { %v898_v2 = vsel %vm896_vm0, %v884_v0, 0  ;;  %s4096_s28 = sld [smem:[#allocation16_spill]]  ;;  %s4097_s3 = sld [smem:[#allocation22_spill]] }
  0x32   : > { %2959 = vmatpush3.bf16.msra.mxu0 %v898_v2  ;;  %s845_s6 = scalar_lea.vmem %s4090_s27, %s3503_s5  ;;  %s849_s30 = scalar_lea.vmem %s4091_s29, %s3503_s5 }
  0x33   : > { %v882_v4 = vld [vmem:[%s845_s6] sm:$0xff]  ;;  %s2893_s6 = sshll.u32 %s3500_s8, 5  ;;  %s823_s17 = scalar_lea.vmem [#allocation2], %s3493_s1 }
  0x34   : > { %v3518_v5 = vld [vmem:[%s849_s30] sm:$0xff]   ;;  %s841_s16 = scalar_lea.vmem %s4092_s23, %s2892_s0  ;;  %v883_v6 = vpack.c.bf16 %v882_v4, %v882_v4  ;;  %s833_s29 = scalar_lea.vmem %s4093_s24, %s3503_s5 }
  0x35   : > { %v874_v7 = vld [vmem:[%s841_s16] sm:$0xff]  ;;  %v876_v8 = vld [vmem:[%s841_s16 + $0x10] sm:$0xff]  ;;  %v875_v9 = vld [vmem:[%s841_s16 + $0x8] sm:$0xff]  ;;  %s3598_s23 = smov 0  }
  0x36   : > { %959 = vperm.xlu0 %3121, %v874_v7   ;;  %969 = vperm.xlu1 %3122, %v876_v8   ;;  %v877_v10 = vld [vmem:[%s841_s16 + $0x18] sm:$0xff]  ;;  %v878_v11 = vld [vmem:[%s841_s16 + $0x20] sm:$0xff]  ;;  %v879_v12 = vld [vmem:[%s841_s16 + $0x28] sm:$0xff]  ;;  %s854_s27 = scalar_lea.vmem %s4094_s26, %s2893_s6 }
  0x37   : > { %2961 = vmatmul.mubr.msk.bf16.vlgmr.msra.gmra.mrb[0].mxu0 %vm892_vm2, %v883_v6  ;;  %v880_v13 = vld [vmem:[%s841_s16 + $0x30] sm:$0xff]  ;;  %v881_v14 = vld [vmem:[%s841_s16 + $0x38] sm:$0xff]  ;;  %v860_v15 = vld [vmem:[%s833_s29] sm:$0xff]  ;;  %s836_s9 = scalar_lea.vmem %s4096_s28, %s3500_s8 }
  0x38   : > { %v2902_v16 = vld [vmem:[%s854_s27] sm:$0xff]   ;;  %v2917_v17 = vld [vmem:[%s854_s27 + $0x8] sm:$0xff]   ;;  %v2918_v24 = vld [vmem:[%s854_s27 + $0x10] sm:$0xff]  }
  0x39   : > { %v2903_v18 = vunpack.c.l.bf16 %v2902_v16  ;;  %v2907_v19 = vunpack.c.l.bf16 %v2917_v17  ;;  %v2904_v22 = vunpack.c.h.bf16 %v2902_v16  ;;  %v2908_v23 = vunpack.c.h.bf16 %v2917_v17  ;;  %v2919_v33 = vld [vmem:[%s854_s27 + $0x18] sm:$0xff]   ;;  %v2833_v47 = vld [vmem:[%s836_s9] ss:$0 sm:$0xff] }
  0x3a   : > { %964 = vperm.xlu0 %3121, %v875_v9   ;;  %974 = vperm.xlu1 %3122, %v877_v10   ;;  %v2911_v31 = vunpack.c.l.bf16 %v2918_v24  ;;  %v2912_v32 = vunpack.c.h.bf16 %v2918_v24  ;;  %v2915_v40 = vunpack.c.l.bf16 %v2919_v33  ;;  %v2916_v41 = vunpack.c.h.bf16 %v2919_v33  ;;  %v2834_v51 = vld [vmem:[%s4097_s3] ss:$0 sm:$0xff] }
  0x3e   : > { %979 = vperm.xlu0 %3121, %v878_v11   ;;  %984 = vperm.xlu1 %3122, %v879_v12  }
  0x42   : > { %989 = vperm.xlu0 %3121, %v880_v13   ;;  %994 = vperm.xlu1 %3122, %v881_v14  }
  0x46   : > { %864 = vperm.xlu0 %3121, %v860_v15  }
  0xb5   : > { %v3532_v20 = vpop.permute.xlu0 %959  ;;  %v3534_v21 = vpop.permute.xlu1 %969 }
  0xb6   : > { %4095 = vst [vmem:[#allocation14_spill] sm:$0xff] %v3532_v20  ;;  %v3537_v25 = vmul.f32 %v2903_v18, %v3532_v20  ;;  %v3540_v26 = vmul.f32 %v2907_v19, %v3534_v21 }
  0xb9   : > { %v3542_v27 = vpop.permute.xlu0 %964  ;;  %v3544_v28 = vpop.permute.xlu1 %974 }
  0xba   : > { %v3547_v29 = vmul.f32 %v2904_v22, %v3542_v27  ;;  %v3550_v30 = vmul.f32 %v2908_v23, %v3544_v28 }
  0xbd   : > { %v3556_v36 = vpop.permute.xlu0 %979  ;;  %v3558_v37 = vpop.permute.xlu1 %984 }
  0xbe   : > { %v3561_v38 = vmul.f32 %v2911_v31, %v3556_v36  ;;  %v3564_v39 = vmul.f32 %v2912_v32, %v3558_v37 }
  0xc1   : > { %v3572_v43 = vpop.permute.xlu0 %989  ;;  %v3574_v44 = vpop.permute.xlu1 %994 }
  0xc2   : > { %v3577_v45 = vmul.f32 %v2915_v40, %v3572_v43  ;;  %v3580_v46 = vmul.f32 %v2916_v41, %v3574_v44 }
  0xc5   : > { %v3584_v49 = vpop.permute.xlu0 %864 }
  0xc6   : > { %v3587_v50 = vmul.f32 %v2833_v47, %v3584_v49 }
 0x10a   : > { %v934_v52 = vpop.f32.mrb[0].mxu0 }
 0x10b   : > { %v935_v53 = vadd.f32 %v2834_v51, %v934_v52   ;;  %v2962_v54 = vpop.f32.mrb[1].mxu0 }
 0x10c   : > { %v937_v55 = vpop.f32.mrb[2].mxu0 }
 0x10d   : > { %v2963_v56 = vpop.f32.mrb[3].mxu0 }
 0x10e LB: >> { %v4061_v57 = vmov 0.0   ;;  %vm1020_vm3 = vcmask 23552   ;;  %vm3302_vm4 = vmmov 0   ;;  %vm1208_vm5 = vcmask 130048   ;;  %s2895_s24 = sshll.u32 %s3296_s23, 3  ;;  %s3613_s29 = sshll.u32 %s3296_s23, 4  ;;  %s3296_s23 = sphi %s3598_s23, %s1014_s23   ;;  %v3292_v53 = vphi %v935_v53, %v4109_v53   ;;  %v3288_v5 = vphi %v3518_v5, %v4108_v5  }
 0x10f   : >> { %2964 = vmatprep.subr.mxu1 %v4061_v57  ;;  %2966 = vmatprep.mubr.msk.f32.mxu1 %vm3302_vm4, %v4061_v57  ;;  %v3609_v58 = vmul.f32 %v3288_v5, %v3584_v49  ;;  %v4098_v34 = vpack.c.bf16 %v3547_v29, %v3537_v25  ;;  %s1199_s7 = scalar_lea.vmem %s4030_s11, %s2895_s24  ;;  %s1136_s16 = scalar_lea.vmem %s4029_s10, %s3613_s29  ;;  %v3632_v61 = vmul.f32 %v3292_v53, %v3584_v49  ;;  %vm1153_vm6 = vcmask 261120   ;;  %v4102_v20 = vld [vmem:[#allocation14_spill] sm:$0xff] }
 0x110   : >> { %v3125_v59 = vld [vmem:[%s1199_s7] sm:$0xff]   ;;  %v3127_v62 = vld [vmem:[%s1136_s16 + $0x8] sm:$0xff]   ;;  %v4099_v35 = vpack.c.bf16 %v3550_v30, %v3540_v26  ;;  %v4100_v42 = vpack.c.bf16 %v3564_v39, %v3561_v38  ;;  %v4101_v48 = vpack.c.bf16 %v3580_v46, %v3577_v45  ;;  %v4060_v0 = vlaneseq  ;;  %s3304_s4 = smov 96   ;;  %s1461_s8 = scalar_lea.vmem %s4033_s14, %s3613_s29 }
 0x111   : >> { %2979 = vmatprep.mubr.msk.bf16.mxu0 %vm1208_vm5, %v4098_v34  ;;  %2965 = vmatpush3.xpose.msk.msra.mxu1 %vm1020_vm3, %v3609_v58  ;;  %v3126_v60 = vld [vmem:[%s1136_s16] sm:$0xff]   ;;  %v1133_v63 = vpack.c.bf16 %v3632_v61, %v3632_v61  ;;  %v3303_v2 = vmov 1966171168   ;;  %s1408_s24 = scalar_lea.vmem %s4037_s18, %s3296_s23  ;;  %s1668_s7 = scalar_lea.vmem %s4032_s13, %s3613_s29  ;;  %vm1104_vm7 = vcmask 1041409   ;;  %vm1105_vm8 = vcmask 1042434  }
 0x112   : >> { %2969 = vmatprep.subr.bf16.mxu1 %v4061_v57  ;;  %2977 = vmatprep.subr.bf16.mxu0 %v3125_v59  ;;  %v1297_v3 = vunpack.c.l.s4 %v3303_v2  ;;  %v3658_v6 = vshrl.u32 %v4060_v0, 7  ;;  %s1466_s16 = scalar_lea.vmem %s4038_s19, %s3296_s23  ;;  %vm1107_vm9 = vcmask 1043459   ;;  %vm1109_vm10 = vcmask 1044484   ;;  %s3305_s0 = smov 64  }
 0x113   : >> { %2978 = vmatpush3.bf16.msra.mxu0 %v3125_v59  ;;  %vm1111_vm11 = vcmask 1045509   ;;  %vm1113_vm12 = vcmask 1046534   ;;  %vm1115_vm13 = vcmask 1047559   ;;  %s1774_s6 = scalar_lea.vmem %s4034_s15, %s3613_s29  ;;  %s1849_s26 = scalar_lea.vmem %s4031_s12, %s3613_s29 }
 0x114   : >> { %2967 = vmatmul.mubr.msk.f32.vlgmr.msra.gmra.mrb[0].mxu1 %vm1020_vm3, %v3609_v58  ;;  %2999 = vmatprep.subr.bf16.mxu0 %v4061_v57  ;;  %v1298_v7 = vunpack.c.0.s8 %v1297_v3  ;;  %v3674_v14 = vsub.s32 0, %v3658_v6  ;;  %s1779_s28 = scalar_lea.vmem %s4040_s21, %s3296_s23  ;;  %s3306_s3 = smov 32  }
 0x115   : >> { %2970 = vmatpush3.bf16.msra.mxu1 %v3126_v60  ;;  %2973 = vmatprep.mubr.msk.bf16.mxu1 %vm3302_vm4, %v4061_v57  ;;  %s4104_s30 = sld [smem:[#allocation25_spill]]  ;;  %s4107_s9 = sld [smem:[#allocation26_spill]] }
 0x116   : >> { %2971 = vmatprep.subr.bf16.mxu1 %v4061_v57  ;;  %2980 = vmatmul.mubr.msk.bf16.vlgmr.msra.gmra.mrb[0].mxu0 %vm1208_vm5, %v4099_v35  ;;  %v3667_v11 = vsub.s32 %v1298_v7, %v3658_v6 }
 0x117   : >> { %2983 = vmatprep.mubr.msk.bf16.mxu0 %vm1208_vm5, %v4100_v42 }
 0x119   : >> { %2972 = vmatpush3.bf16.msra.mxu1 %v3127_v62 }
 0x11c   : >> { %2974 = vmatmul.mubr.msk.bf16.vlgmr.msra.gmra.mrb[4].mxu1 %vm1153_vm6, %v1133_v63 }
 0x11e   : >> { %2984 = vmatmul.mubr.msk.bf16.gmra.mrb[4].mxu0 %vm1208_vm5, %v4101_v48 }
 0x11f   : >> { %3003 = vmatprep.mubr.msk.bf16.mxu0 %vm3302_vm4, %v4061_v57 }
 0x1e7   : >> { %v3655_v4 = vpop.f32.mrb[0].mxu1 }
 0x1e8   : >> { %v2968_v5 = vpop.f32.mrb[1].mxu1 }
 0x1e9   : >> { %v3660_v8 = vpop.f32.mrb[0].mxu0 }
 0x1ea   : >> { %v3662_v9 = vpop.f32.mrb[1].mxu0 }
 0x1eb   : >> { %v3664_v10 = vpop.f32.mrb[2].mxu0 }
 0x1ec   : >> { %v3669_v12 = vpop.f32.mrb[3].mxu0 }
 0x1ef   : >> { %v3671_v13 = vpop.f32.mrb[4].mxu1 }
 0x1f0   : >> { %v3678_v15 = vadd.f32 %v3669_v12, %v3671_v13  ;;  %v2975_v16 = vpop.f32.mrb[5].mxu1  ;;  %v1302_v17 = vrot.slane %v3671_v13, %v3667_v11  ;;  %v1295_v18 = vcombine.high %v3671_v13, %v3671_v13  ;;  %v1286_v19 = vadd.f32 %v3662_v9, %v3671_v13 }
 0x1f1   : >> { %v1194_v22 = vpop.f32.mrb[6].mxu1  ;;  %v1288_v23 = vadd.f32 %v3660_v8, %v3671_v13  ;;  %v1289_v24 = vadd.f32 %v3664_v10, %v3671_v13  ;;  %v3690_v32 = vpop.f32.mrb[4].mxu0 }
 0x1f2   : >> { %v2976_v31 = vpop.f32.mrb[7].mxu1  ;;  %v1318_v33 = vrot.slane %v1302_v17, %v3667_v11  ;;  %v1310_v40 = vcombine.high %v1302_v17, %v1302_v17  ;;  %v1309_v41 = vrot.slane %v1295_v18, %v3667_v11  ;;  %v3696_v47 = vadd.f32 %v3690_v32, %v3671_v13  ;;  %v3698_v51 = vpop.f32.mrb[5].mxu0 }
 0x1f3   : >> { %v1290_v52 = vadd.f32 %v3698_v51, %v3671_v13  ;;  %v3702_v53 = vpop.f32.mrb[6].mxu0  ;;  %v3128_v31 = vld [vmem:[%s1461_s8] sm:$0xff]  }
 0x1f4   : >> { %v1347_v54 = vrot.slane %v1318_v33, %v3674_v14  ;;  %v1340_v55 = vcombine.high %v1318_v33, %v1318_v33  ;;  %v1332_v56 = vrot.slane %v1310_v40, %v3667_v11  ;;  %v3708_v59 = vadd.f32 %v3702_v53, %v3671_v13  ;;  %v3710_v60 = vpop.f32.mrb[7].mxu0  ;;  %2987 = vmatprep.subr.bf16.mxu1 %v3128_v31 }
 0x1f5   : >> { %v1291_v62 = vadd.f32 %v3710_v60, %v3671_v13  ;;  %v1311_v3 = vcombine.high %v1309_v41, %v1309_v41  ;;  %v1325_v7 = vrot.slane %v1309_v41, %v3667_v11  ;;  %2988 = vmatpush3.bf16.msra.mxu1 %v3128_v31 }
 0x1f6   : >> { %1376 = vrot.lane.b32.xlu0 %v1347_v54, %s3304_s4  ;;  %v1355_v63 = vrot.slane %v1340_v55, %v3674_v14  ;;  %v1342_v2 = vcombine.high %v1332_v56, %v1332_v56  ;;  %v1351_v5 = vrot.slane %v1332_v56, %v3674_v14  ;;  %v3129_v54 = vld [vmem:[%s1461_s8 + $0x8] sm:$0xff]   ;;  %v2850_v56 = vld [vmem:[%s1408_s24] ss:$0 sm:$0xff]  ;;  %s1757_s8 = scalar_lea.vmem %s4039_s20, %s3296_s23 }
 0x1f7   : >> { %v1339_v17 = vrot.slane %v1311_v3, %v3667_v11  ;;  %v1363_v18 = vrot.slane %v1325_v7, %v3674_v14  ;;  %v1341_v22 = vcombine.high %v1325_v7, %v1325_v7  ;;  %2989 = vmatprep.subr.bf16.mxu1 %v3129_v54 }
 0x1f8   : >> { %1380 = vrot.lane.b32.xlu1 %v1355_v63, %s3304_s4  ;;  %v1359_v16 = vrot.slane %v1342_v2, %v3674_v14 }
 0x1f9   : >> { %v1367_v33 = vrot.slane %v1339_v17, %v3674_v14  ;;  %v1343_v40 = vcombine.high %v1339_v17, %v1339_v17  ;;  %v1371_v41 = vrot.slane %v1341_v22, %v3674_v14  ;;  %2990 = vmatpush3.bf16.msra.mxu1 %v3129_v54 }
 0x1fa   : >> { %1378 = vrot.lane.b32.xlu0 %v1351_v5, %s3304_s4  ;;  %3015 = vmatprep.subr.bf16.mxu1 %v4061_v57 }
 0x1fb   : >> { %v1375_v55 = vrot.slane %v1343_v40, %v3674_v14 }
 0x1fc   : >> { %1382 = vrot.lane.b32.xlu1 %v1359_v16, %s3304_s4 }
 0x1fe   : >> { %1384 = vrot.lane.b32.xlu0 %v1363_v18, %s3304_s4 }
 0x200   : >> { %1386 = vrot.lane.b32.xlu1 %v1367_v33, %s3304_s4 }
 0x202   : >> { %1388 = vrot.lane.b32.xlu0 %v1371_v41, %s3304_s4 }
 0x204   : >> { %1390 = vrot.lane.b32.xlu1 %v1375_v55, %s3304_s4 }
 0x268   : >> { %v1377_v63 = vpop.permute.xlu0 %1376 }
 0x269   : >> { %v1400_v2 = vadd.f32 %v1377_v63, %v1286_v19 }
 0x26a   : >> { %v1381_v3 = vpop.permute.xlu1 %1380 }
 0x26b   : >> { %v1416_v5 = vadd.f32 %v2850_v56, %v1400_v2  ;;  %v1402_v7 = vadd.f32 %v1381_v3, %v1288_v23 }
 0x26c   : >> { %v1379_v16 = vpop.permute.xlu0 %1378 }
 0x26d   : >> { %v1424_v17 = vmul.f32 0.5, %v1416_v5  ;;  %v1418_v18 = vadd.f32 %v2850_v56, %v1402_v7  ;;  %v1401_v22 = vadd.f32 %v1379_v16, %v3678_v15 }
 0x26e   : >> { %v1383_v31 = vpop.permute.xlu1 %1382 }
 0x26f   : >> { %3138 = vtanh.f32 %v1424_v17  ;;  %v1426_v33 = vmul.f32 0.5, %v1418_v18  ;;  %v1417_v40 = vadd.f32 %v2850_v56, %v1401_v22  ;;  %v1403_v41 = vadd.f32 %v1383_v31, %v1289_v24 }
 0x270   : >> { %v1385_v54 = vpop.permute.xlu0 %1384 }
 0x271   : >> { %3140 = vtanh.f32 %v1426_v33  ;;  %v1425_v55 = vmul.f32 0.5, %v1417_v40  ;;  %v1419_v34 = vadd.f32 %v2850_v56, %v1403_v41  ;;  %v1404_v35 = vadd.f32 %v1385_v54, %v1290_v52 }
 0x272   : >> { %v1387_v42 = vpop.permute.xlu1 %1386 }
 0x273   : >> { %3142 = vtanh.f32 %v1425_v55  ;;  %v1427_v19 = vmul.f32 0.5, %v1419_v34  ;;  %v1420_v63 = vadd.f32 %v2850_v56, %v1404_v35  ;;  %v1405_v23 = vadd.f32 %v1387_v42, %v1291_v62 }
 0x274   : >> { %v1389_v2 = vpop.permute.xlu0 %1388 }
 0x275   : >> { %3144 = vtanh.f32 %v1427_v19  ;;  %v1428_v3 = vmul.f32 0.5, %v1420_v63  ;;  %v1421_v5 = vadd.f32 %v2850_v56, %v1405_v23  ;;  %v1406_v15 = vadd.f32 %v1389_v2, %v3696_v47 }
 0x276   : >> { %v1391_v7 = vpop.permute.xlu1 %1390 }
 0x277   : >> { %3146 = vtanh.f32 %v1428_v3  ;;  %v1429_v16 = vmul.f32 0.5, %v1421_v5  ;;  %v1422_v24 = vadd.f32 %v2850_v56, %v1406_v15  ;;  %v1407_v18 = vadd.f32 %v1391_v7, %v3708_v59 }
 0x279   : >> { %v3139_v22 = vpop.eup %3138  ;;  %3148 = vtanh.f32 %v1429_v16  ;;  %v1430_v52 = vmul.f32 0.5, %v1422_v24  ;;  %v1423_v31 = vadd.f32 %v2850_v56, %v1407_v18 }
 0x27a   : >> { %v1440_v35 = vadd.f32 1.0, %v3139_v22 }
 0x27b   : >> { %v3141_v40 = vpop.eup %3140  ;;  %3150 = vtanh.f32 %v1430_v52  ;;  %v1431_v34 = vmul.f32 0.5, %v1423_v31 }
 0x27c   : >> { %v1442_v62 = vadd.f32 1.0, %v3141_v40  ;;  %v1448_v47 = vmul.f32 %v1440_v35, %v1424_v17 }
 0x27d   : >> { %v3143_v42 = vpop.eup %3142  ;;  %3152 = vtanh.f32 %v1431_v34 }
 0x27e   : >> { %v1441_v41 = vadd.f32 1.0, %v3143_v42  ;;  %v1450_v5 = vmul.f32 %v1442_v62, %v1426_v33 }
 0x27f   : >> { %v3145_v54 = vpop.eup %3144 }
 0x280   : >> { %v1449_v63 = vmul.f32 %v1441_v41, %v1425_v55  ;;  %v1443_v23 = vadd.f32 1.0, %v3145_v54 }
 0x281   : >> { %v3147_v2 = vpop.eup %3146 }
 0x282   : >> { %v1456_v15 = vpack.c.bf16 %v1449_v63, %v1448_v47  ;;  %v1451_v59 = vmul.f32 %v1443_v23, %v1427_v19  ;;  %v1444_v7 = vadd.f32 1.0, %v3147_v2 }
 0x283   : >> { %v3149_v48 = vpop.eup %3148 }
 0x284   : >> { %v1457_v24 = vpack.c.bf16 %v1451_v59, %v1450_v5  ;;  %v1445_v56 = vadd.f32 1.0, %v3149_v48  ;;  %2991 = vmatprep.mubr.msk.bf16.mxu1 %vm1153_vm6, %v1456_v15  ;;  %v1452_v22 = vmul.f32 %v1444_v7, %v1428_v3  ;;  %v3130_v48 = vld [vmem:[%s1668_s7] sm:$0xff]   ;;  %v3131_v3 = vld [vmem:[%s1668_s7 + $0x8] sm:$0xff]   ;;  %s2073_s7 = scalar_lea.vmem %s4104_s30, %s3613_s29 }
 0x285   : >> { %v3151_v18 = vpop.eup %3150  ;;  %3000 = vmatpush3.bf16.msra.mxu0 %v3130_v48 }
 0x286   : >> { %v1453_v31 = vmul.f32 %v1445_v56, %v1429_v16  ;;  %v1446_v40 = vadd.f32 1.0, %v3151_v18  ;;  %2992 = vmatmul.mubr.msk.bf16.vlgmr.msra.gmra.mrb[8].mxu1 %vm1153_vm6, %v1457_v24  ;;  %3001 = vmatprep.subr.bf16.mxu0 %v4061_v57  ;;  %v2852_v16 = vld [vmem:[%s1466_s16] ss:$0 sm:$0xff] }
 0x287   : >> { %v3153_v17 = vpop.eup %3152 }
 0x288   : >> { %v1458_v55 = vpack.c.bf16 %v1453_v31, %v1452_v22  ;;  %v1447_v35 = vadd.f32 1.0, %v3153_v17  ;;  %v1454_v33 = vmul.f32 %v1446_v40, %v1430_v52 }
 0x289   : >> { %3002 = vmatpush3.bf16.msra.mxu0 %v3131_v3 }
 0x28a   : >> { %v1455_v42 = vmul.f32 %v1447_v35, %v1431_v34  ;;  %2995 = vmatprep.mubr.msk.bf16.mxu1 %vm1153_vm6, %v1458_v55  ;;  %3007 = vmatprep.subr.bf16.mxu0 %v4061_v57 }
 0x28c   : >> { %v1459_v19 = vpack.c.bf16 %v1455_v42, %v1454_v33 }
 0x28e   : >> { %2996 = vmatmul.mubr.msk.bf16.gmra.mrb[12].mxu1 %vm1153_vm6, %v1459_v19 }
 0x28f   : >> { %3019 = vmatprep.mubr.msk.bf16.mxu1 %vm3302_vm4, %v4061_v57 }
 0x359   : >> { %v2993_v52 = vpop.f32.mrb[8].mxu1 }
 0x35a   : >> { %v1541_v34 = vadd.f32 %v2993_v52, %v2852_v16  ;;  %v1532_v62 = vpop.f32.mrb[9].mxu1 }
 0x35b   : >> { %v1533_v41 = vadd.f32 %v2852_v16, %v1532_v62  ;;  %v2994_v54 = vpop.f32.mrb[10].mxu1 }
 0x35c   : >> { %v1565_v47 = vmul.f32 0.5, %v1541_v34  ;;  %v1544_v63 = vadd.f32 %v2994_v54, %v2852_v16  ;;  %v1535_v23 = vpop.f32.mrb[11].mxu1 }
 0x35d   : >> { %v1563_v2 = vmul.f32 0.5, %v1533_v41  ;;  %v1536_v5 = vadd.f32 %v2852_v16, %v1535_v23 }
 0x35e   : >> { %3154 = vtanh.f32 %v1565_v47  ;;  %v1566_v15 = vmul.f32 0.5, %v1544_v63 }
 0x35f   : >> { %3156 = vtanh.f32 %v1563_v2  ;;  %v1564_v59 = vmul.f32 0.5, %v1536_v5 }
 0x360   : >> { %3158 = vtanh.f32 %v1566_v15 }
 0x361   : >> { %3160 = vtanh.f32 %v1564_v59  ;;  %v2997_v7 = vpop.f32.mrb[12].mxu1 }
 0x362   : >> { %v1557_v24 = vadd.f32 %v2997_v7, %v2852_v16  ;;  %v1548_v56 = vpop.f32.mrb[13].mxu1 }
 0x363   : >> { %v1549_v18 = vadd.f32 %v2852_v16, %v1548_v56  ;;  %v2998_v22 = vpop.f32.mrb[14].mxu1 }
 0x364   : >> { %v1569_v31 = vmul.f32 0.5, %v1557_v24  ;;  %v1560_v40 = vadd.f32 %v2998_v22, %v2852_v16  ;;  %v1551_v17 = vpop.f32.mrb[15].mxu1 }
 0x365   : >> { %v1567_v55 = vmul.f32 0.5, %v1549_v18  ;;  %v1552_v35 = vadd.f32 %v2852_v16, %v1551_v17 }
 0x366   : >> { %3162 = vtanh.f32 %v1569_v31  ;;  %v1570_v33 = vmul.f32 0.5, %v1560_v40 }
 0x367   : >> { %3164 = vtanh.f32 %v1567_v55  ;;  %v1568_v42 = vmul.f32 0.5, %v1552_v35 }
 0x368   : >> { %v3155_v19 = vpop.eup %3154  ;;  %3166 = vtanh.f32 %v1570_v33 }
 0x369   : >> { %v3157_v48 = vpop.eup %3156  ;;  %v1581_v3 = vadd.f32 1.0, %v3155_v19  ;;  %3168 = vtanh.f32 %v1568_v42 }
 0x36a   : >> { %v3159_v52 = vpop.eup %3158  ;;  %v1579_v34 = vadd.f32 1.0, %v3157_v48 }
 0x36b   : >> { %v3161_v62 = vpop.eup %3160  ;;  %v1589_v41 = vmul.f32 %v1581_v3, %v1565_v47  ;;  %v1582_v54 = vadd.f32 1.0, %v3159_v52 }
 0x36c   : >> { %v1587_v63 = vmul.f32 %v1579_v34, %v1563_v2  ;;  %v1580_v23 = vadd.f32 1.0, %v3161_v62 }
 0x36d   : >> { %v1597_v5 = vmul.f32 %v1589_v41, %v3534_v21  ;;  %v1590_v7 = vmul.f32 %v1582_v54, %v1566_v15 }
 0x36e   : >> { %v1595_v16 = vmul.f32 %v1587_v63, %v4102_v20  ;;  %v1588_v24 = vmul.f32 %v1580_v23, %v1564_v59 }
 0x36f   : >> { %v1617_v56 = vsel %vm1153_vm6, %v1597_v5, 0.0  ;;  %v1598_v18 = vmul.f32 %v1590_v7, %v3544_v28 }
 0x370   : >> { %v3163_v22 = vpop.eup %3162  ;;  %v1618_v40 = vrot.slane %v1617_v56, 4  ;;  %v1603_v17 = vsel %vm1153_vm6, %v1595_v16, 0.0  ;;  %v1596_v35 = vmul.f32 %v1588_v24, %v3542_v27 }
 0x371   : >> { %v3165_v47 = vpop.eup %3164  ;;  %v1604_v19 = vrot.slane %v1603_v17, 4  ;;  %v1624_v2 = vsel %vm1153_vm6, %v1598_v18, 0.0  ;;  %v1585_v48 = vadd.f32 1.0, %v3163_v22 }
 0x372   : >> { %v3167_v3 = vpop.eup %3166  ;;  %v1619_v15 = vadd.f32 %v1618_v40, %v1617_v56  ;;  %v1625_v52 = vrot.slane %v1624_v2, 4  ;;  %v1610_v59 = vsel %vm1153_vm6, %v1596_v35, 0.0  ;;  %v1583_v34 = vadd.f32 1.0, %v3165_v47 }
 0x373   : >> { %v3169_v62 = vpop.eup %3168  ;;  %v1605_v41 = vadd.f32 %v1604_v19, %v1603_v17  ;;  %v1611_v54 = vrot.slane %v1610_v59, 4  ;;  %v1593_v63 = vmul.f32 %v1585_v48, %v1569_v31  ;;  %v1586_v23 = vadd.f32 1.0, %v3167_v3 }
 0x374   : >> { %v1620_v5 = vrot.slane %v1619_v15, 2  ;;  %v1626_v7 = vadd.f32 %v1625_v52, %v1624_v2  ;;  %v1591_v16 = vmul.f32 %v1583_v34, %v1567_v55  ;;  %v1584_v24 = vadd.f32 1.0, %v3169_v62 }
 0x375   : >> { %v1606_v1 = vrot.slane %v1605_v41, 2  ;;  %v1612_v0 = vadd.f32 %v1611_v54, %v1610_v59  ;;  %v1601_v18 = vmul.f32 %v1593_v63, %v3572_v43  ;;  %v1594_v22 = vmul.f32 %v1586_v23, %v1570_v33 }
 0x376   : >> { %v1621_v57 = vadd.f32 %v1620_v5, %v1619_v15  ;;  %v1627_v56 = vrot.slane %v1626_v7, 2  ;;  %v1599_v40 = vmul.f32 %v1591_v16, %v3556_v36  ;;  %v1592_v35 = vmul.f32 %v1584_v24, %v1568_v42 }
 0x377   : >> { %v1607_v47 = vadd.f32 %v1606_v1, %v1605_v41  ;;  %v1613_v20 = vrot.slane %v1612_v0, 2  ;;  %v1645_v17 = vsel %vm1153_vm6, %v1601_v18, 0.0  ;;  %v1602_v31 = vmul.f32 %v1594_v22, %v3574_v44 }
 0x378   : >> { %v1622_v19 = vrot.slane %v1621_v57, 1  ;;  %v1628_v2 = vadd.f32 %v1627_v56, %v1626_v7  ;;  %v1646_v55 = vrot.slane %v1645_v17, 4  ;;  %v1631_v48 = vsel %vm1153_vm6, %v1599_v40, 0.0 }
 0x379   : >> { %v1608_v3 = vrot.slane %v1607_v47, 1  ;;  %v1614_v52 = vadd.f32 %v1613_v20, %v1612_v0  ;;  %v1632_v59 = vrot.slane %v1631_v48, 4  ;;  %v1652_v33 = vsel %vm1153_vm6, %v1602_v31, 0.0 }
 0x37a   : >> { %v1623_v15 = vadd.f32 %v1622_v19, %v1621_v57  ;;  %v1629_v34 = vrot.slane %v1628_v2, 1  ;;  %v1647_v62 = vadd.f32 %v1646_v55, %v1645_v17  ;;  %v1653_v42 = vrot.slane %v1652_v33, 4 }
 0x37b   : >> { %v1609_v1 = vadd.f32 %v1608_v3, %v1607_v47  ;;  %v1615_v41 = vrot.slane %v1614_v52, 1  ;;  %v1633_v54 = vadd.f32 %v1632_v59, %v1631_v48  ;;  %v1600_v63 = vmul.f32 %v1592_v35, %v3558_v37 }
 0x37c   : >> { %v1630_v23 = vadd.f32 %v1629_v34, %v1628_v2  ;;  %v1648_v5 = vrot.slane %v1647_v62, 2  ;;  %v1654_v7 = vadd.f32 %v1653_v42, %v1652_v33  ;;  %v1661_v0 = vpack.c.bf16 %v1623_v15, %v1623_v15 }
 0x37d   : >> { %v1659_v16 = vpack.c.bf16 %v1609_v1, %v1609_v1  ;;  %v1616_v24 = vadd.f32 %v1615_v41, %v1614_v52  ;;  %v1634_v18 = vrot.slane %v1633_v54, 2  ;;  %v1638_v20 = vsel %vm1153_vm6, %v1600_v63, 0.0 }
 0x37e   : >> { %v1662_v22 = vpack.c.bf16 %v1630_v23, %v1630_v23  ;;  %v1649_v56 = vadd.f32 %v1648_v5, %v1647_v62  ;;  %v1655_v57 = vrot.slane %v1654_v7, 2  ;;  %v1639_v31 = vrot.slane %v1638_v20, 4 }
 0x37f   : >> { %v1660_v40 = vpack.c.bf16 %v1616_v24, %v1616_v24  ;;  %v1635_v17 = vadd.f32 %v1634_v18, %v1633_v54  ;;  %v1681_v19 = vunpack.c.l.b16 %v1659_v16  ;;  %v1683_v48 = vunpack.c.l.b16 %v1661_v0 }
 0x380   : >> { %v1656_v47 = vadd.f32 %v1655_v57, %v1654_v7  ;;  %v1640_v55 = vadd.f32 %v1639_v31, %v1638_v20  ;;  %v1684_v3 = vunpack.c.l.b16 %v1662_v22  ;;  %v1650_v52 = vrot.slane %v1649_v56, 1 }
 0x381   : >> { %v1682_v35 = vunpack.c.l.b16 %v1660_v40  ;;  %v1636_v2 = vrot.slane %v1635_v17, 1 }
 0x382   : >> { %v1657_v15 = vrot.slane %v1656_v47, 1  ;;  %v1641_v34 = vrot.slane %v1640_v55, 2  ;;  %v1651_v54 = vadd.f32 %v1650_v52, %v1649_v56  ;;  %v3133_v52 = vld [vmem:[%s1774_s6 + $0x8] sm:$0xff]  }
 0x383   : >> { %v1689_v59 = vsel %vm1104_vm7, %v1682_v35, %v1681_v19  ;;  %v1637_v33 = vadd.f32 %v1636_v2, %v1635_v17  ;;  %v2863_v19 = vld [vmem:[%s1757_s8] ss:$0 sm:$0xff]  ;;  %s2219_s8 = scalar_lea.vmem %s4107_s9, %s3296_s23 }
 0x384   : >> { %v1690_v62 = vsel %vm1105_vm8, %v1683_v48, %v1689_v59  ;;  %v1642_v41 = vadd.f32 %v1641_v34, %v1640_v55  ;;  %v1658_v23 = vadd.f32 %v1657_v15, %v1656_v47  ;;  %v1665_v24 = vpack.c.bf16 %v1651_v54, %v1651_v54  ;;  %1764 = vrot.lane.b32.xlu1 %v2863_v19, %s3305_s0  ;;  %v3136_v19 = vld [vmem:[%s2073_s7] sm:$0xff]  }
 0x385   : >> { %v1663_v42 = vpack.c.bf16 %v1637_v33, %v1637_v33  ;;  %v1691_v1 = vsel %vm1107_vm9, %v1684_v3, %v1690_v62  ;;  %v4103_v47 = vmov 0.0   ;;  %v3132_v3 = vld [vmem:[%s1774_s6] sm:$0xff]  }
 0x386   : >> { %v1643_v5 = vrot.slane %v1642_v41, 1  ;;  %v1666_v18 = vpack.c.bf16 %v1658_v23, %v1658_v23  ;;  %v1687_v22 = vunpack.c.l.b16 %v1665_v24 }
 0x387   : >> { %v1685_v63 = vunpack.c.l.b16 %v1663_v42  ;;  %v3134_v42 = vld [vmem:[%s1849_s26] sm:$0xff]  }
 0x388   : >> { %v1644_v16 = vadd.f32 %v1643_v5, %v1642_v41  ;;  %v1688_v57 = vunpack.c.l.b16 %v1666_v18  ;;  %3016 = vmatpush3.bf16.msra.mxu1 %v3134_v42  ;;  %v2865_v5 = vld [vmem:[%s1779_s28] ss:$0 sm:$0xff] }
 0x389   : >> { %v1692_v7 = vsel %vm1109_vm10, %v1685_v63, %v1691_v1  ;;  %3017 = vmatprep.subr.bf16.mxu1 %v4103_v47 }
 0x38a   : >> { %v1664_v20 = vpack.c.bf16 %v1644_v16, %v1644_v16 }
 0x38c   : >> { %v1686_v0 = vunpack.c.l.b16 %v1664_v20 }
 0x38e   : >> { %v1693_v56 = vsel %vm1111_vm11, %v1686_v0, %v1692_v7 }
 0x38f   : >> { %v1694_v40 = vsel %vm1113_vm12, %v1687_v22, %v1693_v56 }
 0x390   : >> { %v1695_v17 = vsel %vm1115_vm13, %v1688_v57, %v1694_v40 }
 0x391   : >> { %v1696_v31 = vpack.c.b16 %v1695_v17, %v1695_v17 }
 0x393   : >> { %3004 = vmatmul.mubr.msk.bf16.vlgmr.msra.gmra.mrb[8].mxu0 %vm1153_vm6, %v1696_v31 }
 0x394   : >> { %3011 = vmatprep.mubr.msk.bf16.mxu0 %vm3302_vm4, %v4103_v47  ;;  %3008 = vmatpush3.bf16.msra.mxu0 %v3132_v3 }
 0x395   : >> { %3009 = vmatprep.subr.bf16.mxu0 %v4103_v47 }
 0x398   : >> { %3010 = vmatpush3.bf16.msra.mxu0 %v3133_v52 }
 0x399   : >> { %3023 = vmatprep.subr.bf16.mxu0 %v3136_v19 }
 0x3f6   : >> { %v1765_v33 = vpop.permute.xlu1 %1764 }
 0x466   : >> { %v1746_v35 = vpop.f32.mrb[8].mxu0 }
 0x467   : >> { %1753 = vrot.lane.b32.xlu0 %v1746_v35, %s3305_s0  ;;  %v3005_v2 = vpop.f32.mrb[9].mxu0  ;;  %v3137_v35 = vld [vmem:[%s2073_s7 + $0x8] sm:$0xff]  }
 0x468   : >> { %v1749_v55 = vpop.f32.mrb[10].mxu0 }
 0x469   : >> { %v3006_v48 = vpop.f32.mrb[11].mxu0 }
 0x4d9   : >> { %v1754_v59 = vpop.permute.xlu0 %1753 }
 0x4da   : >> { %v1756_v15 = vadd.f32 %v1754_v59, %v3671_v13  ;;  %v3135_v13 = vld [vmem:[%s1849_s26 + $0x8] sm:$0xff]   ;;  %s4106_s26 = sld [smem:[#allocation27_spill]] }
 0x4db   : >> { %3018 = vmatpush3.bf16.msra.mxu1 %v3135_v13 }
 0x4dc   : >> { %v1767_v34 = vadd.f32 %v1765_v33, %v1756_v15  ;;  %3035 = vmatprep.subr.mxu1 %v4103_v47 }
 0x4de   : >> { %v1768_v62 = vmul.f32 0.5, %v1767_v34 }
 0x4e0   : >> { %3170 = vtanh.f32 %v1768_v62  ;;  %s2078_s27 = scalar_lea.vmem %s4106_s26, %s3296_s23 }
 0x4ea   : >> { %v3171_v1 = vpop.eup %3170 }
 0x4eb   : >> { %v1770_v41 = vadd.f32 1.0, %v3171_v1 }
 0x4ed   : >> { %v1771_v54 = vmul.f32 %v1770_v41, %v1768_v62 }
 0x4ef   : >> { %v1772_v63 = vpack.c.bf16 %v1771_v54, %v1771_v54 }
 0x4f1   : >> { %1788 = vrot.lane.b32.xlu0 %v1772_v63, %s3305_s0  ;;  %s2018_s0 = scalar_lea.vmem %s4041_s22, %s3296_s23  ;;  %s1014_s23 = sadd.s32 1, %s3296_s23  }
 0x4f2   : >> { %p1011_p11 = scmp.ge.s32.totalorder %s1014_s23, 4  }
 0x4f3   : > { %s4112_s6 = sld [smem:[#allocation23_spill]] (%p1011_p11)  ;;  %s4114_s26 = sld [smem:[#allocation6_spill]] (%p1011_p11) }
 0x4f4   : > { %s4116_s9 = sld [smem:[#allocation24_spill]] (%p1011_p11)  ;;  %s4117_s24 = sld [smem:[#allocation28_spill]] (%p1011_p11) }
 0x4f5   : > { %s3308_s23 = smov (%p1011_p11), [#allocation2]  }
 0x4f9   : > { %s4113_s7 = smov (%p1011_p11), %s4112_s6 }
 0x4fa   : > { %v3209_v21 = vld [vmem:[%s4113_s7 + $0x8] sm:$0xff] (%p1011_p11)   ;;  %v2884_v25 = vld [vmem:[%s4116_s9] ss:$0 sm:$0xff] (%p1011_p11) }
 0x563   : >> { %v1789_v23 = vpop.permute.xlu0 %1788 }
 0x564   : >> { %3012 = vmatmul.mubr.msk.bf16.vlgmr.msra.gmra.mrb[12].mxu0 %vm1153_vm6, %v1789_v23 }
 0x565   : >> { %3024 = vmatpush3.bf16.msra.mxu0 %v3136_v19 }
 0x566   : >> { %3025 = vmatprep.subr.bf16.mxu0 %v3137_v35 }
 0x569   : >> { %3026 = vmatpush3.bf16.msra.mxu0 %v3137_v35 }
 0x637   : >> { %v1839_v7 = vpop.f32.mrb[12].mxu0 }
 0x638   : >> { %v1840_v16 = vadd.f32 %v2865_v5, %v1839_v7  ;;  %v3013_v24 = vpop.f32.mrb[13].mxu0 }
 0x639   : >> { %v1842_v18 = vpop.f32.mrb[14].mxu0 }
 0x63a   : >> { %v1845_v20 = vadd.f32 %v1840_v16, %v3632_v61  ;;  %v3014_v0 = vpop.f32.mrb[15].mxu0  ;;  %v2873_v61 = vld [vmem:[%s2018_s0] ss:$0 sm:$0xff]  ;;  %s4111_s0 = sld [smem:[#allocation9_spill]] (%p1011_p11) }
 0x63b   : >> { %2025 = vrot.lane.b32.xlu0 %v2873_v61, %s3306_s3 }
 0x63c   : >> { %v3808_v22 = vmul.f32 %v1845_v20, %v3584_v49  }
 0x63e   : >> { %v3812_v57 = vpack.c.bf16 %v3808_v22, %v3808_v22 }
 0x640   : >> { %3020 = vmatmul.mubr.msk.bf16.vlgmr.msra.gmra.mrb[16].mxu1 %vm1153_vm6, %v3812_v57  ;;  %s2889_s5 = sshll.u32 (%p1011_p11), %s4111_s0, 7  ;;  %s4118_s0 = sand.u32 (%p1011_p11), 1, %s4114_s26  }
 0x641   : >> { %3036 = vmatpush3.msra.mxu1 %v3609_v58  ;;  %3037 = vmatprep.mubr.msk.f32.mxu1 %vm3302_vm4, %v4103_v47  ;;  %s2628_s30 = scalar_lea.sflag (%p1011_p11), [#allocation3], %s4118_s0 }
 0x6ad   : >> { %v2026_v61 = vpop.permute.xlu0 %2025 }
 0x713   : >> { %v1903_v56 = vpop.f32.mrb[16].mxu1 }
 0x714   : >> { %1910 = vrot.lane.b32.xlu1 %v1903_v56, %s3306_s3  ;;  %v3021_v40 = vpop.f32.mrb[17].mxu1  ;;  %v1921_v47 = vcombine.high %v1903_v56, %v1903_v56  ;;  %v1928_v2 = vrot.slane %v1903_v56, %v3667_v11 }
 0x715   : >> { %v1906_v17 = vpop.f32.mrb[18].mxu1 }
 0x716   : >> { %v3022_v31 = vpop.f32.mrb[19].mxu1  ;;  %v1935_v55 = vrot.slane %v1921_v47, %v3667_v11  ;;  %v1936_v48 = vcombine.high %v1928_v2, %v1928_v2  ;;  %v1944_v52 = vrot.slane %v1928_v2, %v3667_v11 }
 0x718   : >> { %v1937_v3 = vcombine.high %v1935_v55, %v1935_v55  ;;  %v1951_v59 = vrot.slane %v1935_v55, %v3667_v11  ;;  %v1958_v33 = vrot.slane %v1936_v48, %v3667_v11  ;;  %v1966_v34 = vcombine.high %v1944_v52, %v1944_v52 }
 0x719   : >> { %v1973_v41 = vrot.slane %v1944_v52, %v3674_v14 }
 0x71a   : >> { %v1965_v15 = vrot.slane %v1937_v3, %v3667_v11  ;;  %v1967_v62 = vcombine.high %v1951_v59, %v1951_v59  ;;  %v1968_v42 = vcombine.high %v1958_v33, %v1958_v33  ;;  %v1977_v54 = vrot.slane %v1958_v33, %v3674_v14 }
 0x71b   : >> { %v1981_v63 = vrot.slane %v1966_v34, %v3674_v14  ;;  %v1989_v23 = vrot.slane %v1951_v59, %v3674_v14 }
 0x71c   : >> { %v1969_v1 = vcombine.high %v1965_v15, %v1965_v15  ;;  %v1985_v13 = vrot.slane %v1968_v42, %v3674_v14  ;;  %v1993_v5 = vrot.slane %v1965_v15, %v3674_v14  ;;  %v1997_v7 = vrot.slane %v1967_v62, %v3674_v14 }
 0x71e   : >> { %v2001_v11 = vrot.slane %v1969_v1, %v3674_v14 }
 0x786   : >> { %v1911_v16 = vpop.permute.xlu1 %1910 }
 0x787   : >> { %v1913_v24 = vadd.f32 %v1911_v16, %v3662_v9  ;;  %v1914_v18 = vadd.f32 %v1911_v16, %v3669_v12  ;;  %v1915_v20 = vadd.f32 %v3660_v8, %v1911_v16  ;;  %v1916_v0 = vadd.f32 %v3664_v10, %v1911_v16 }
 0x788   : >> { %v1917_v56 = vadd.f32 %v1911_v16, %v3698_v51  ;;  %v1918_v40 = vadd.f32 %v1911_v16, %v3710_v60  ;;  %v1919_v17 = vadd.f32 %v3690_v32, %v1911_v16  ;;  %v1920_v31 = vadd.f32 %v3702_v53, %v1911_v16 }
 0x789   : >> { %v2010_v19 = vadd.f32 %v1973_v41, %v1913_v24  ;;  %v2011_v35 = vadd.f32 %v1977_v54, %v1914_v18  ;;  %v2012_v47 = vadd.f32 %v1981_v63, %v1915_v20  ;;  %v2013_v2 = vadd.f32 %v1985_v13, %v1916_v0 }
 0x78a   : >> { %v2014_v9 = vadd.f32 %v1989_v23, %v1917_v56  ;;  %v2015_v55 = vadd.f32 %v1993_v5, %v1918_v40  ;;  %v2016_v12 = vadd.f32 %v1997_v7, %v1919_v17  ;;  %v2017_v48 = vadd.f32 %v2001_v11, %v1920_v31 }
 0x78b   : >> { %v2028_v8 = vadd.f32 %v2026_v61, %v2010_v19  ;;  %v2029_v3 = vadd.f32 %v2026_v61, %v2011_v35  ;;  %v2030_v10 = vadd.f32 %v2026_v61, %v2012_v47  ;;  %v2031_v52 = vadd.f32 %v2026_v61, %v2013_v2 }
 0x78c   : >> { %v2032_v59 = vadd.f32 %v2026_v61, %v2014_v9  ;;  %v2033_v51 = vadd.f32 %v2026_v61, %v2015_v55  ;;  %v2034_v32 = vadd.f32 %v2026_v61, %v2016_v12  ;;  %v2035_v53 = vadd.f32 %v2026_v61, %v2017_v48 }
 0x78d   : >> { %v2036_v33 = vmul.f32 0.5, %v2028_v8  ;;  %v2037_v60 = vmul.f32 0.5, %v2029_v3  ;;  %v2038_v15 = vmul.f32 0.5, %v2030_v10  ;;  %v2039_v34 = vmul.f32 0.5, %v2031_v52 }
 0x78e   : >> { %v2040_v62 = vmul.f32 0.5, %v2032_v59  ;;  %v2041_v42 = vmul.f32 0.5, %v2033_v51  ;;  %v2042_v1 = vmul.f32 0.5, %v2034_v32  ;;  %v2043_v41 = vmul.f32 0.5, %v2035_v53 }
 0x78f   : >> { %3172 = vtanh.f32 %v2036_v33  ;;  %v1019_v52 = vmul.f32 %v3609_v58, %v3609_v58  ;;  %v2263_v51 = vrot.slane %v3587_v50, %v3674_v14 }
 0x790   : >> { %3174 = vtanh.f32 %v2037_v60 }
 0x791   : >> { %3176 = vtanh.f32 %v2038_v15  ;;  %v1021_v59 = vsel %vm1020_vm3, %v1019_v52, 0.0 }
 0x792   : >> { %3178 = vtanh.f32 %v2039_v34 }
 0x793   : >> { %3180 = vtanh.f32 %v2040_v62 }
 0x794   : >> { %3182 = vtanh.f32 %v2041_v42 }
 0x795   : >> { %3184 = vtanh.f32 %v2042_v1 }
 0x796   : >> { %3186 = vtanh.f32 %v2043_v41 }
 0x799   : >> { %v3173_v54 = vpop.eup %3172 }
 0x79a   : >> { %v3175_v63 = vpop.eup %3174  ;;  %v2052_v23 = vadd.f32 1.0, %v3173_v54  ;;  %v4105_v54 = vlaneseq }
 0x79b   : >> { %v3177_v13 = vpop.eup %3176  ;;  %v2053_v5 = vadd.f32 1.0, %v3175_v63 }
 0x79c   : >> { %v3179_v7 = vpop.eup %3178  ;;  %v2060_v16 = vmul.f32 %v2052_v23, %v2036_v33  ;;  %v2054_v11 = vadd.f32 1.0, %v3177_v13  ;;  %v2276_v33 = vsub.s32 2, %v3658_v6  ;;  %v1099_v63 = vand.u32 127, %v4105_v54 }
 0x79d   : >> { %v3181_v24 = vpop.eup %3180  ;;  %v2061_v18 = vmul.f32 %v2053_v5, %v2037_v60  ;;  %v2055_v20 = vadd.f32 1.0, %v3179_v7  ;;  %v2269_v60 = vsub.s32 1, %v3658_v6  ;;  %v1119_v7 = vmul.f32 2.0, %v3655_v4 }
 0x79e   : >> { %v3183_v0 = vpop.eup %3182  ;;  %v2062_v61 = vmul.f32 %v2054_v11, %v2038_v15  ;;  %v2056_v56 = vadd.f32 1.0, %v3181_v24  ;;  %v2277_v15 = vrot.slane %v3587_v50, %v2276_v33  ;;  %v3870_v23 = vsub.s32 %v1099_v63, %v3658_v6 }
 0x79f   : >> { %v3185_v40 = vpop.eup %3184  ;;  %v2068_v17 = vpack.c.bf16 %v2061_v18, %v2060_v16  ;;  %v2063_v31 = vmul.f32 %v2055_v20, %v2039_v34  ;;  %v2057_v19 = vadd.f32 1.0, %v3183_v0  ;;  %v2270_v32 = vrot.slane %v3587_v50, %v2269_v60 }
 0x7a0   : >> { %v3187_v35 = vpop.eup %3186  ;;  %v2064_v47 = vmul.f32 %v2056_v56, %v2040_v62  ;;  %v2058_v2 = vadd.f32 1.0, %v3185_v40  ;;  %v2283_v34 = vsub.s32 3, %v3658_v6 }
 0x7a1   : >> { %2090 = vrot.lane.b32.xlu1 %v2068_v17, %s3304_s4  ;;  %v2069_v9 = vpack.c.bf16 %v2063_v31, %v2062_v61  ;;  %v2065_v55 = vmul.f32 %v2057_v19, %v2041_v42  ;;  %v2059_v12 = vadd.f32 1.0, %v3187_v35  ;;  %v2290_v35 = vsub.s32 4, %v3658_v6 }
 0x7a2   : >> { %v2066_v48 = vmul.f32 %v2058_v2, %v2042_v1  ;;  %v2284_v53 = vrot.slane %v3587_v50, %v2283_v34 }
 0x7a3   : >> { %2092 = vrot.lane.b32.xlu0 %v2069_v9, %s3304_s4  ;;  %v2070_v8 = vpack.c.bf16 %v2065_v55, %v2064_v47  ;;  %v2067_v3 = vmul.f32 %v2059_v12, %v2043_v41  ;;  %v2291_v47 = vrot.slane %v3587_v50, %v2290_v35  ;;  %v2297_v9 = vsub.s32 5, %v3658_v6 }
 0x7a5   : >> { %2094 = vrot.lane.b32.xlu1 %v2070_v8, %s3304_s4  ;;  %v2071_v10 = vpack.c.bf16 %v2067_v3, %v2066_v48  ;;  %v2298_v55 = vrot.slane %v3587_v50, %v2297_v9  ;;  %v2304_v48 = vsub.s32 6, %v3658_v6  ;;  %v2311_v3 = vsub.s32 7, %v3658_v6 }
 0x7a7   : >> { %2096 = vrot.lane.b32.xlu0 %v2071_v10, %s3304_s4  ;;  %v2312_v10 = vrot.slane %v3587_v50, %v2311_v3  ;;  %s3214_s4 = sshll.u32 (%p1011_p11), %s3308_s23, 4  ;;  %s3215_s4 = int_to_ptr.vmem [resolvable:$false] %s3214_s4 }
 0x7a8   : > { %s3216_s16 = scalar_lea.vmem (%p1011_p11), %s3215_s4, 256 }
 0x7ab   : >> { %2272 = vbcast.lane.b32.xlu0 %v2270_v32, 256 }
 0x7c9   : >> { %1022 = vadd.xlane.f32.xlu1 %v1021_v59  ;;  %v2875_v59 = vld [vmem:[%s2078_s27] ss:$0 sm:$0xff] }
 0x7da   : >> { %2265 = vbcast.lane.b32.xlu1 %v2263_v51, 256 }
 0x7de   : >> { %2279 = vbcast.lane.b32.xlu1 %v2277_v15, 256 }
 0x7e2   : >> { %2286 = vbcast.lane.b32.xlu1 %v2284_v53, 256 }
 0x813   : >> { %v2091_v62 = vpop.permute.xlu1 %2090 }
 0x814   : >> { %3027 = vmatprep.mubr.msk.bf16.mxu0 %vm1153_vm6, %v2091_v62 }
 0x815   : >> { %v2093_v42 = vpop.permute.xlu0 %2092 }
 0x816   : >> { %3028 = vmatmul.mubr.msk.bf16.vlgmr.msra.gmra.mrb[16].mxu0 %vm1153_vm6, %v2093_v42 }
 0x817   : >> { %v2095_v1 = vpop.permute.xlu1 %2094 }
 0x818   : >> { %3031 = vmatprep.mubr.msk.bf16.mxu0 %vm1153_vm6, %v2095_v1 }
 0x819   : >> { %v2097_v41 = vpop.permute.xlu0 %2096 }
 0x81e   : >> { %3032 = vmatmul.mubr.msk.bf16.gmra.mrb[20].mxu0 %vm1153_vm6, %v2097_v41 }
 0x856   : >> { %v1023_v13 = vpop.xlane.xlu1 %1022 }
 0x857   : >> { %v1103_v5 = vrot.slane %v1023_v13, %v3870_v23 }
 0x859   : >> { %v1118_v16 = vadd.f32 %v1103_v5, %v1023_v13 }
 0x85b   : >> { %v1120_v11 = vsub.f32 %v1118_v16, %v1119_v7 }
 0x85d   : >> { %v1121_v24 = vmax.f32 %v1120_v11, 0.0 }
 0x85f   : >> { %v1122_v18 = vadd.f32 1e-08, %v1121_v24 }
 0x861   : >> { %3188 = vrsqrt.f32 %v1122_v18  ;;  %vm1125_vm14 = vcmp.eq.f32.partialorder %v1122_v18, inf  ;;  %v1128_v61 = vand.u32 2147483648, %v1122_v18  ;;  %vm1127_vm15 = vcmp.eq.f32.partialorder %v1122_v18, 0.0 }
 0x86b   : >> { %v3189_v20 = vpop.eup %3188 }
 0x86c   : >> { %v1124_v0 = vmul.f32 %v3189_v20, %v1122_v18 }
 0x86e   : >> { %v1126_v56 = vsel %vm1125_vm14, %v1122_v18, %v1124_v0 }
 0x86f   : >> { %v1129_v40 = vsel %vm1127_vm15, %v1128_v61, %v1126_v56 }
 0x870   : >> { %v1130_v17 = vadd.f32 1.0, %v1129_v40 }
 0x872   : >> { %3190 = vrcp.f32 %v1130_v17 }
 0x87c   : >> { %v3874_v31 = vpop.eup %3190 }
 0x87d   : >> { %v2343_v19 = vrot.slane %v3874_v31, %v2269_v60  ;;  %v2336_v4 = vrot.slane %v3874_v31, %v3674_v14  ;;  %v2350_v2 = vrot.slane %v3874_v31, %v2276_v33  ;;  %v2357_v12 = vrot.slane %v3874_v31, %v2283_v34 }
 0x87e   : >> { %v2305_v14 = vrot.slane %v3587_v50, %v2304_v48  ;;  %v2364_v8 = vrot.slane %v3874_v31, %v2290_v35  ;;  %v2371_v52 = vrot.slane %v3874_v31, %v2297_v9 }
 0x87f   : >> { %2345 = vbcast.lane.b32.xlu1 %v2343_v19, 256  ;;  %2338 = vbcast.lane.b32.xlu0 %v2336_v4, 256 }
 0x883   : >> { %2352 = vbcast.lane.b32.xlu1 %v2350_v2, 256  ;;  %2293 = vbcast.lane.b32.xlu0 %v2291_v47, 256  ;;  %v2882_v47 = vld [vmem:[%s2219_s8] ss:$0 sm:$0xff] }
 0x887   : >> { %2359 = vbcast.lane.b32.xlu1 %v2357_v12, 256  ;;  %2300 = vbcast.lane.b32.xlu0 %v2298_v55, 256 }
 0x88b   : >> { %2366 = vbcast.lane.b32.xlu1 %v2364_v8, 256  ;;  %2307 = vbcast.lane.b32.xlu0 %v2305_v14, 256 }
 0x88f   : >> { %2373 = vbcast.lane.b32.xlu1 %v2371_v52, 256  ;;  %2314 = vbcast.lane.b32.xlu0 %v2312_v10, 256 }
 0x8e9   : >> { %v3029_v51 = vpop.f32.mrb[16].mxu0 }
 0x8ea   : >> { %v2165_v33 = vadd.f32 %v3029_v51, %v2875_v59  ;;  %v2156_v60 = vpop.f32.mrb[17].mxu0 }
 0x8eb   : >> { %v2157_v15 = vadd.f32 %v2875_v59, %v2156_v60  ;;  %v3030_v32 = vpop.f32.mrb[18].mxu0 }
 0x8ec   : >> { %v2189_v34 = vmul.f32 0.5, %v2165_v33  ;;  %v2168_v53 = vadd.f32 %v3030_v32, %v2875_v59  ;;  %v2159_v62 = vpop.f32.mrb[19].mxu0 }
 0x8ed   : >> { %v2187_v42 = vmul.f32 0.5, %v2157_v15  ;;  %v2160_v1 = vadd.f32 %v2875_v59, %v2159_v62 }
 0x8ee   : >> { %3192 = vtanh.f32 %v2189_v34  ;;  %v2190_v41 = vmul.f32 0.5, %v2168_v53 }
 0x8ef   : >> { %3194 = vtanh.f32 %v2187_v42  ;;  %v2188_v54 = vmul.f32 0.5, %v2160_v1 }
 0x8f0   : >> { %3196 = vtanh.f32 %v2190_v41 }
 0x8f1   : >> { %3198 = vtanh.f32 %v2188_v54  ;;  %v3033_v63 = vpop.f32.mrb[20].mxu0 }
 0x8f2   : >> { %v2181_v13 = vadd.f32 %v3033_v63, %v2875_v59  ;;  %v2172_v5 = vpop.f32.mrb[21].mxu0 }
 0x8f3   : >> { %v2173_v7 = vadd.f32 %v2875_v59, %v2172_v5  ;;  %v3034_v16 = vpop.f32.mrb[22].mxu0 }
 0x8f4   : >> { %v2193_v11 = vmul.f32 0.5, %v2181_v13  ;;  %v2184_v24 = vadd.f32 %v3034_v16, %v2875_v59  ;;  %v2175_v18 = vpop.f32.mrb[23].mxu0 }
 0x8f5   : >> { %v2191_v20 = vmul.f32 0.5, %v2173_v7  ;;  %v2176_v0 = vadd.f32 %v2875_v59, %v2175_v18 }
 0x8f6   : >> { %3200 = vtanh.f32 %v2193_v11  ;;  %v2194_v61 = vmul.f32 0.5, %v2184_v24 }
 0x8f7   : >> { %3202 = vtanh.f32 %v2191_v20  ;;  %v2192_v56 = vmul.f32 0.5, %v2176_v0 }
 0x8f8   : >> { %v3193_v40 = vpop.eup %3192  ;;  %3204 = vtanh.f32 %v2194_v61 }
 0x8f9   : >> { %v3195_v17 = vpop.eup %3194  ;;  %v2205_v19 = vadd.f32 1.0, %v3193_v40  ;;  %3206 = vtanh.f32 %v2192_v56 }
 0x8fa   : >> { %v3197_v4 = vpop.eup %3196  ;;  %v2203_v35 = vadd.f32 1.0, %v3195_v17 }
 0x8fb   : >> { %v3199_v2 = vpop.eup %3198  ;;  %v2213_v9 = vmul.f32 %v2205_v19, %v2189_v34  ;;  %v2206_v55 = vadd.f32 1.0, %v3197_v4  ;;  %v3307_v4 = vmov 0  }
 0x8fc   : >> { %v2211_v12 = vmul.f32 %v2203_v35, %v2187_v42  ;;  %v2204_v14 = vadd.f32 1.0, %v3199_v2  ;;  %3123 = vset.pattern.permute.xlu1 %v3307_v4  ;;  %3124 = vset.pattern.permute.xlu0 %v3307_v4  ;;  %v2378_v35 = vrot.slane %v3874_v31, %v2304_v48  ;;  %v2266_v2 = vpop.permute.xlu1 %2265 }
 0x8fd   : >> { %v2214_v8 = vmul.f32 %v2206_v55, %v2190_v41  ;;  %v2229_v10 = vmul.f32 %v2882_v47, %v2213_v9  ;;  %v2273_v55 = vpop.permute.xlu0 %2272 }
 0x8fe   : >> { %v2227_v52 = vmul.f32 %v2882_v47, %v2211_v12  ;;  %v2212_v33 = vmul.f32 %v2204_v14, %v2188_v54 }
 0x8ff   : >> { %v2241_v59 = vsel %vm1153_vm6, %v2229_v10, 0.0  ;;  %v2230_v15 = vmul.f32 %v2882_v47, %v2214_v8 }
 0x900   : >> { %v3201_v51 = vpop.eup %3200  ;;  %2242 = vadd.xlane.f32.xlu1 %v2241_v59  ;;  %v2235_v60 = vsel %vm1153_vm6, %v2227_v52, 0.0  ;;  %v2228_v7 = vmul.f32 %v2882_v47, %v2212_v33  ;;  %v2280_v9 = vpop.permute.xlu1 %2279 }
 0x901   : >> { %v3203_v32 = vpop.eup %3202  ;;  %v2209_v53 = vadd.f32 1.0, %v3201_v51  ;;  %2236 = vadd.xlane.f32.xlu0 %v2235_v60  ;;  %v2244_v5 = vsel %vm1153_vm6, %v2230_v15, 0.0  ;;  %v2339_v14 = vpop.permute.xlu0 %2338 }
 0x902   : >> { %v3205_v62 = vpop.eup %3204  ;;  %v2207_v1 = vadd.f32 1.0, %v3203_v32  ;;  %v2238_v40 = vsel %vm1153_vm6, %v2228_v7, 0.0 }
 0x903   : >> { %v3207_v34 = vpop.eup %3206  ;;  %v2217_v63 = vmul.f32 %v2209_v53, %v2193_v11  ;;  %v2210_v42 = vadd.f32 1.0, %v3205_v62 }
 0x904   : >> { %v2215_v13 = vmul.f32 %v2207_v1, %v2191_v20  ;;  %v2208_v41 = vadd.f32 1.0, %v3207_v34 }
 0x905   : >> { %v2218_v16 = vmul.f32 %v2210_v42, %v2194_v61  ;;  %2245 = vadd.xlane.f32.xlu0 %v2244_v5  ;;  %v2233_v54 = vmul.f32 %v2882_v47, %v2217_v63  ;;  %v2294_v10 = vpop.permute.xlu0 %2293 }
 0x906   : >> { %v2231_v18 = vmul.f32 %v2882_v47, %v2215_v13  ;;  %v2216_v0 = vmul.f32 %v2208_v41, %v2192_v56  ;;  %v2385_v56 = vrot.slane %v3874_v31, %v2311_v3 }
 0x907   : >> { %v2253_v24 = vsel %vm1153_vm6, %v2233_v54, 0.0  ;;  %v2234_v17 = vmul.f32 %v2882_v47, %v2218_v16 }
 0x908   : >> { %2254 = vadd.xlane.f32.xlu1 %v2253_v24  ;;  %v2247_v11 = vsel %vm1153_vm6, %v2231_v18, 0.0  ;;  %v2232_v19 = vmul.f32 %v2882_v47, %v2216_v0  ;;  %v2287_v47 = vpop.permute.xlu1 %2286 }
 0x909   : >> { %2239 = vadd.xlane.f32.xlu0 %v2238_v40  ;;  %v2256_v20 = vsel %vm1153_vm6, %v2234_v17, 0.0  ;;  %v2301_v59 = vpop.permute.xlu0 %2300 }
 0x90a   : >> { %v2250_v61 = vsel %vm1153_vm6, %v2232_v19, 0.0 }
 0x90c   : >> { %2248 = vadd.xlane.f32.xlu1 %v2247_v11  ;;  %v2346_v12 = vpop.permute.xlu1 %2345 }
 0x90d   : >> { %2257 = vadd.xlane.f32.xlu0 %v2256_v20  ;;  %v2308_v33 = vpop.permute.xlu0 %2307 }
 0x910   : >> { %v2353_v8 = vpop.permute.xlu1 %2352 }
 0x911   : >> { %2251 = vadd.xlane.f32.xlu0 %v2250_v61  ;;  %v2315_v3 = vpop.permute.xlu0 %2314 }
 0x914   : >> { %v2360_v52 = vpop.permute.xlu1 %2359 }
 0x918   : >> { %v2367_v51 = vpop.permute.xlu1 %2366 }
 0x91c   : >> { %v2374_v60 = vpop.permute.xlu1 %2373 }
 0x91d   : >> { %2387 = vbcast.lane.b32.xlu1 %v2385_v56, 256 }
 0x927   : >> { %2380 = vbcast.lane.b32.xlu0 %v2378_v35, 256 }
 0x98d   : >> { %v2243_v15 = vpop.xlane.xlu1 %2242 }
 0x98e   : >> { %v2326_v32 = vmul.f32 %v2280_v9, %v2243_v15  ;;  %v2237_v6 = vpop.xlane.xlu0 %2236 }
 0x98f   : >> { %v2324_v53 = vmul.f32 %v2266_v2, %v2237_v6 }
 0x990   : >> { %v2399_v31 = vmul.f32 %v2353_v8, %v2326_v32 }
 0x991   : >> { %v2397_v48 = vmul.f32 %v2339_v14, %v2324_v53 }
 0x992   : >> { %v2246_v62 = vpop.xlane.xlu0 %2245  ;;  %2420 = vperm.xlu1 %3123, %v2399_v31  }
 0x993   : >> { %v2327_v1 = vmul.f32 %v2287_v47, %v2246_v62  ;;  %2414 = vperm.xlu0 %3124, %v2397_v48  }
 0x995   : >> { %v2400_v34 = vmul.f32 %v2360_v52, %v2327_v1  ;;  %v2255_v63 = vpop.xlane.xlu1 %2254 }
 0x996   : >> { %v2240_v42 = vpop.xlane.xlu0 %2239  ;;  %v2330_v0 = vmul.f32 %v2308_v33, %v2255_v63 }
 0x997   : >> { %v2325_v13 = vmul.f32 %v2273_v55, %v2240_v42  ;;  %2423 = vperm.xlu0 %3124, %v2400_v34  }
 0x999   : >> { %v2398_v41 = vmul.f32 %v2346_v12, %v2325_v13  ;;  %v2249_v5 = vpop.xlane.xlu1 %2248 }
 0x99a   : >> { %v2328_v7 = vmul.f32 %v2294_v10, %v2249_v5  ;;  %v2258_v16 = vpop.xlane.xlu0 %2257 }
 0x99b   : >> { %2417 = vperm.xlu1 %3123, %v2398_v41   ;;  %v2331_v40 = vmul.f32 %v2315_v3, %v2258_v16 }
 0x99c   : >> { %v2401_v54 = vmul.f32 %v2367_v51, %v2328_v7 }
 0x99d   : >> { %v2388_v11 = vpop.permute.xlu1 %2387 }
 0x99e   : >> { %v2252_v24 = vpop.xlane.xlu0 %2251  ;;  %v2404_v61 = vmul.f32 %v2388_v11, %v2331_v40 }
 0x99f   : >> { %v2329_v18 = vmul.f32 %v2301_v59, %v2252_v24  ;;  %2426 = vperm.xlu1 %3123, %v2401_v54  }
 0x9a1   : >> { %v2402_v17 = vmul.f32 %v2374_v60, %v2329_v18 }
 0x9a2   : >> { %v2381_v20 = vpop.permute.xlu0 %2380 }
 0x9a3   : >> { %v2403_v19 = vmul.f32 %v2381_v20, %v2330_v0  ;;  %2429 = vperm.xlu0 %3124, %v2402_v17  }
 0x9a5   : >> { %2432 = vperm.xlu1 %3123, %v2403_v19  }
 0x9a7   : >> { %2435 = vperm.xlu0 %3124, %v2404_v61  }
 0xa11   : >> { %v2421_v4 = vpop.permute.xlu1 %2420 }
 0xa12   : >> { %v2415_v56 = vpop.permute.xlu0 %2414  ;;  %v2448_v47 = vrot.slane %v2421_v4, %v3870_v23 }
 0xa13   : >> { %v2440_v2 = vrot.slane %v2415_v56, %v3870_v23 }
 0xa16   : >> { %v2424_v55 = vpop.permute.xlu0 %2423 }
 0xa17   : >> { %v2452_v10 = vrot.slane %v2424_v55, %v3870_v23 }
 0xa1a   : >> { %v2418_v35 = vpop.permute.xlu1 %2417 }
 0xa1b   : >> { %v2444_v9 = vrot.slane %v2418_v35, %v3870_v23 }
 0xa1d   : >> { %v2469_v12 = vsel %vm1104_vm7, %v2444_v9, %v2440_v2 }
 0xa1e   : >> { %v2470_v14 = vsel %vm1105_vm8, %v2448_v47, %v2469_v12  ;;  %v2427_v8 = vpop.permute.xlu1 %2426 }
 0xa1f   : >> { %v2456_v52 = vrot.slane %v2427_v8, %v3870_v23  ;;  %v2471_v59 = vsel %vm1107_vm9, %v2452_v10, %v2470_v14 }
 0xa21   : >> { %v2472_v60 = vsel %vm1109_vm10, %v2456_v52, %v2471_v59 }
 0xa22   : >> { %v2430_v51 = vpop.permute.xlu0 %2429 }
 0xa23   : >> { %v2460_v33 = vrot.slane %v2430_v51, %v3870_v23 }
 0xa24   : >> { %v2433_v3 = vpop.permute.xlu1 %2432 }
 0xa25   : >> { %v2473_v15 = vsel %vm1111_vm11, %v2460_v33, %v2472_v60  ;;  %v2464_v32 = vrot.slane %v2433_v3, %v3870_v23 }
 0xa26   : >> { %v2436_v6 = vpop.permute.xlu0 %2435 }
 0xa27   : >> { %v2474_v53 = vsel %vm1113_vm12, %v2464_v32, %v2473_v15  ;;  %v2468_v31 = vrot.slane %v2436_v6, %v3870_v23  ;;  %v4110_v23 = vmov (%p1011_p11), 0.0  }
 0xa28   : > { %3040 = vmatprep.subr.bf16.mxu0 (%p1011_p11), %v4110_v23  ;;  %3044 = vmatprep.mubr.msk.bf16.mxu0 (%p1011_p11), %vm3299_vm1, %v4110_v23 }
 0xa29   : >> { %v2475_v48 = vsel %vm1115_vm13, %v2468_v31, %v2474_v53  ;;  %v4109_v53 = vmov %v3808_v22 }
 0xa2a   : >> { %3038 = vmatmul.mubr.msk.f32.vlgmr.msra.gmra.mrb[2].mxu1 %vm892_vm2, %v2475_v48  ;;  %v2477_v62 = vsel %vm892_vm2, %v2475_v48, 0.0 }
 0xa2b   : >> { %2478 = vadd.xlane.f32.xlu1 %v2477_v62 }
 0xab8   : >> { %v2479_v1 = vpop.xlane.xlu1 %2478 }
 0xab9   : >> { %v2552_v34 = vmul.f32 %v2479_v1, %v3609_v58 }
 0xabb   : >> { %v2553_v63 = vadd.f32 %v2552_v34, %v3609_v58  ;;  %v3208_v58 = vld [vmem:[%s4112_s6] sm:$0xff] (%p1011_p11)   ;;  %s3972_s6 = scalar_lea.hbm (%p1011_p11), %s4117_s24, %s2889_s5 }
 0xabc   : > { %3041 = vmatpush3.bf16.msra.mxu0 (%p1011_p11), %v3208_v58 }
 0xabd   : > { %3042 = vmatprep.subr.bf16.mxu0 (%p1011_p11), %v4110_v23 }
 0xac0   : > { %3043 = vmatpush3.bf16.msra.mxu0 (%p1011_p11), %v3209_v21 }
 0xac3   : > { %3045 = vmatmul.mubr.msk.bf16.vlgmr.msra.gmra.mrb[0].mxu0 (%p1011_p11), %vm1153_vm6, %v3812_v57 }
 0xafc   : > { %1013 = sbr.rel (!%p1011_p11) target bundleno = 270 (0x10e), region = 199 }
 0xafd   : >> { %v2548_v42 = vpop.f32.mrb[2].mxu1 }
 0xafe   : >> { %v2554_v13 = vsub.f32 %v2553_v63, %v2548_v42  ;;  %v3039_v41 = vpop.f32.mrb[3].mxu1 }
 0xb00   : >> { %v2555_v7 = vmul.f32 %v2554_v13, %v3584_v49  }
 0xb02   : >> { %v4108_v5 = vmov %v2555_v7  ;;  %2626 = vst.msk [vmem:[%s858_s2] sm:$0xff] (%p1011_p11), %vm1020_vm3, %v2555_v7  ;;  %s2645_s2 = sshll.u32 (%p1011_p11), %s823_s17, 4  ;;  %s3974_s2 = int_to_ptr.vmem [resolvable:$true] %s2645_s2 }
 0xb03   : > { %s3210_s29 = scalar_lea.vmem %s3974_s2, 128  ;;  %p3217_p1 = scmp.lt.s32.totalorder %s3974_s2, %s3215_s4 }
 0xb04   : > { %p3211_p12 = scmp.ne.s32.totalorder %s3974_s2, %s3210_s29  ;;  %p3218_p2 = scmp.lt.s32.totalorder %s3216_s16, %s3210_s29 }
 0xb06   : > { %p3212_p13 = pnand %p3211_p12, %p3477_p5  ;;  %p3219_p3 = por %p3218_p2, %p3217_p1 }
 0xb08   : > { %p3213_p0 = pneg %p3212_p13 }
 0xb0a   : > { %p3220_p4 = pnand %p3219_p3, %p3213_p0 }
 0xb96   : > { %v2618_v26 = vpop.f32.mrb[0].mxu0 }
 0xb97   : > { %v2619_v27 = vadd.f32 %v2884_v25, %v2618_v26  ;;  %v3046_v28 = vpop.f32.mrb[1].mxu0 }
 0xb98   : > { %v2621_v29 = vpop.f32.mrb[2].mxu0 }
 0xb99   : > { %2624 = vst.msk [vmem:[%s823_s17] sm:$0xff] %vm892_vm2, %v2619_v27  ;;  %v3047_v30 = vpop.f32.mrb[3].mxu0 }
 0xb9a   : > { %3223 = shalt.err (!%p3220_p4)
}
 0xb9b   : > { %s3224_s1 = scalar_lea.hbm %s3972_s6, 128  ;;  %s3228_s28 = scalar_lea.hbm %s4117_s24, 256 }
 0xb9c   : > { %p3225_p7 = scmp.ne.s32.totalorder %s3972_s6, %s3224_s1  ;;  %p3229_p10 = scmp.lt.u32.totalorder %s3972_s6, %s4117_s24 }
 0xb9d   : > { %p3230_p11 = scmp.lt.u32.totalorder %s3228_s28, %s3224_s1  ;;  %p3232_p13 = scmp.lt.u32.totalorder %s3224_s1, %s3972_s6 }
 0xb9e   : > { %p3226_p8 = pnand %p3225_p7, %p3477_p5 }
 0xb9f   : > { %p3231_p12 = por %p3230_p11, %p3229_p10 }
 0xba0   : > { %p3227_p9 = pneg %p3226_p8 }
 0xba1   : > { %p3233_p0 = por %p3232_p13, %p3231_p12 }
 0xba3   : > { %p3234_p1 = pnand %p3233_p0, %p3227_p9 }
 0xba5   : > { %3237 = shalt.err (!%p3234_p1)
}
 0xba6   : > { %3048 = dma.vmem_to_hbm [thread:$0]  (%p3477_p5), %s3974_s2, 128, %s3972_s6, %s2628_s30  }
 0xba7 PF: > { %s4119_s8 = sld [smem:[#allocation8_spill]]  ;;  %s4120_s3 = sld [smem:[#allocation5_spill]] }
 0xbad   : > { %p3054_p2 = scmp.ge.s32.totalorder %s4119_s8, 2  ;;  %s2660_s29 = sand.u32 1, %s4120_s3  }
 0xbae   : > { %s2661_s23 = scalar_lea.sflag [#allocation3], %s2660_s29 }
 0xbaf   : > { %p3051_p3 = pnand %p3054_p2, %p3481_p6 }
 0xbb1   : > { %3267 = dma.done.wait (!%p3051_p3), %s2661_s23, 128  }
 0xbb2   : > { %3269 = vsyncadd (!%p3051_p3), %s2661_s23, 4294967168  ;;  %s4122_s30 = sld [smem:[#allocation10_spill]]  ;;  %s4123_s29 = sld [smem:[#allocation6_spill]] }
 0xbb3   : > { %s4124_s2 = sld [smem:[#allocation7_spill]]  ;;  %s4125_s6 = sld [smem:[#allocation11_spill]] }
 0xbb8   : > { %p36_p4 = scmp.ge.s32.totalorder %s4122_s30, 4  }
 0xbba   :  { %38 = sbr.rel (!%p36_p4) target bundleno = 18 (0x12), region = 210 }
 0xbc1   :  { %2673 = vsyncpa [#allocation3], 1 }
 0xbc2   :  { %2675 = vsyncpa [#allocation3 + $0x1], 1 }

</bundles_post_ra>
